<compile_context>
chip_gen: v7x
topology: tpu7x:2x2x1
jax: 0.10.0
libtpu: 0.0.40
codegen_flags: <defaults>
</compile_context>

<pallas_src>
import functools
import numpy as np

import jax
import jax.numpy as jnp
from jax.experimental import pallas as pl
from jax.experimental.pallas import tpu as pltpu

F32 = jnp.float32
BF16 = jnp.bfloat16
NEG_INF = -1e9
LN_EPS = 1e-6


# ----------------------------- in-kernel helpers -----------------------------

def _layer_norm(x, g, b):
    mu = jnp.mean(x, axis=-1, keepdims=True)
    var = jnp.mean(jnp.square(x - mu), axis=-1, keepdims=True)
    return (x - mu) * jax.lax.rsqrt(var + LN_EPS) * g + b


def _attend(q, k, v, bias, fc, *, n_head, d_k, d_v, scale):
    """Multi-head attention on flattened (batch*seq) slabs.

    q: (Rq, H*dk) f32, k: (Rk, H*dk) f32, v: (Rk, H*dv) f32,
    bias: (Rq, Rk) additive mask bias (block-diagonal over batch, f32),
    fc: (H*dv, D) bf16.  The output projection is folded into the static head
    loop by accumulating against row-slices of fc (no concat / head relayout).
    """
    out = None
    for h in range(n_head):
        qh = q[:, h * d_k:(h + 1) * d_k].astype(BF16)
        kh = k[:, h * d_k:(h + 1) * d_k].astype(BF16)
        vh = v[:, h * d_v:(h + 1) * d_v].astype(BF16)
        s = jnp.einsum('qd,kd->qk', qh, kh, preferred_element_type=F32) * scale + bias
        m = jnp.max(s, axis=-1, keepdims=True)
        e = jnp.exp(s - m)
        p = e * pl.reciprocal(jnp.sum(e, axis=-1, keepdims=True), approx=True)
        ho = jnp.dot(p.astype(BF16), vh, preferred_element_type=F32)          # (Rq, dv)
        contrib = jnp.dot(ho.astype(BF16), fc[h * d_v:(h + 1) * d_v, :],
                          preferred_element_type=F32)                         # (Rq, D)
        out = contrib if out is None else out + contrib
    return out


# ------------------------------- fused kernel --------------------------------

def _decoder_layer_kernel(ha_ref, hs_ref, enc_ref, sbias_ref, cbias_ref, pos_ref,
                          wqkv_d_ref, fc_d_ref, g1_ref, b1_ref,
                          wq_e_ref, wkv_e_ref, fc_e_ref, g2_ref, b2_ref,
                          w1_ref, c1_ref, w2_ref, c2_ref, g3_ref, b3_ref,
                          o_ref, *, n_head, d_k, d_v):
    """One grid step = one (bb*S, D) slab; all three sub-layers fused."""
    hk = n_head * d_k
    scale = 1.0 / float(np.sqrt(d_k))

    # ---- stage 1: positional encoding + type-area self-attention + LN ----
    # Shared Wq/Wk/Wv => the 4-term disentangled attention equals standard MHA
    # on t = (h_a + pos) + (h_s + pos), which is also the residual.
    t = ha_ref[...] + hs_ref[...] + 2.0 * pos_ref[...]                       # (R, D) f32
    proj = jnp.dot(t.astype(BF16), wqkv_d_ref[...],
                   preferred_element_type=F32)                               # (R, 2*H*dk + H*dv)
    attn = _attend(proj[:, :hk], proj[:, hk:2 * hk], proj[:, 2 * hk:],
                   sbias_ref[...], fc_d_ref[...],
                   n_head=n_head, d_k=d_k, d_v=d_v, scale=scale)
    x = _layer_norm(attn + t, g1_ref[...], b1_ref[...])

    # ---- stage 2: encoder-decoder attention + LN ----
    q2 = jnp.dot(x.astype(BF16), wq_e_ref[...], preferred_element_type=F32)  # (R, H*dk)
    kv2 = jnp.dot(enc_ref[...].astype(BF16), wkv_e_ref[...],
                  preferred_element_type=F32)                                # (Re, H*(dk+dv))
    attn2 = _attend(q2, kv2[:, :hk], kv2[:, hk:],
                    cbias_ref[...], fc_e_ref[...],
                    n_head=n_head, d_k=d_k, d_v=d_v, scale=scale)
    y = _layer_norm(attn2 + x, g2_ref[...], b2_ref[...])

    # ---- stage 3: position-wise FFN + LN ----
    hdn = jnp.maximum(jnp.dot(y.astype(BF16), w1_ref[...],
                              preferred_element_type=F32) + c1_ref[...], 0.0)
    z = jnp.dot(hdn.astype(BF16), w2_ref[...], preferred_element_type=F32) + c2_ref[...]
    o_ref[...] = _layer_norm(z + y, g3_ref[...], b3_ref[...])


# ------------------------------- wrapper (glue) -------------------------------

def _block_diag_bias(mask):
    """(B, Sq, Sk) {0,1} mask -> (B*Sq, B*Sk) additive bias.

    Diagonal blocks: 0 where attend, -1e9 where masked.  Off-diagonal (cross
    batch) blocks: -1e9.  Lets attention run on batch-flattened slabs.
    """
    B, Sq, Sk = mask.shape
    blocks = jnp.where(mask == 0, NEG_INF, 0.0).astype(F32)
    full = jnp.full((B, Sq, B, Sk), NEG_INF, F32)
    idx = jnp.arange(B)
    full = full.at[idx, :, idx, :].set(blocks)
    return full.reshape(B * Sq, B * Sk)


def decoder_layer(h_a, h_s, encode_output, slf_attn_mask, dec_enc_attn_mask,
                  params, pos_table, *, encode_length, n_head, d_k, d_v,
                  batch_block=None):
    """Pallas implementation of DecoderLayer.forward (dropout = identity)."""
    B, S, D = h_a.shape
    Se = encode_output.shape[1]
    pos = pos_table[encode_length:encode_length + S]          # decode-mode offset

    pd, pe, pf = params['dec'], params['encdec'], params['ffn']
    # One-time weight prep (outside the kernel): fuse Q/K/V projections and cast
    # all matmul weights to bf16 (MXU-native). Biases / LayerNorm params stay f32.
    wqkv_d = jnp.concatenate([pd['wq'], pd['wk'], pd['wv']], axis=1).astype(BF16)
    fc_d = pd['fc'].astype(BF16)
    wq_e = pe['wq'].astype(BF16)
    wkv_e = jnp.concatenate([pe['wk'], pe['wv']], axis=1).astype(BF16)
    fc_e = pe['fc'].astype(BF16)
    w1 = pf['w1'].astype(BF16)
    w2 = pf['w2'].astype(BF16)

    # Whole batch per grid step by default (fits easily in VMEM at these sizes;
    # with one step, every block equals the full array so the (8,128) block
    # constraints are trivially satisfied on all of v5e/v6e/v7x).
    bb = B if batch_block is None else batch_block
    assert B % bb == 0, "batch_block must divide batch"
    grid = (B // bb,)

    # Flatten batch into rows: every projection / LN / FFN runs on one
    # (bb*S, D) slab; batch separation inside attention is carried by the
    # block-diagonal bias, so the kernel never loops over batch.
    ha2 = h_a.reshape(B * S, D)
    hs2 = h_s.reshape(B * S, D)
    enc2 = encode_output.reshape(B * Se, D)
    pos2 = jnp.tile(pos, (B, 1))
    sbias = _block_diag_bias(slf_attn_mask)                   # (B*S,  B*S)
    cbias = _block_diag_bias(dec_enc_attn_mask)               # (B*S,  B*Se)

    def rows(n):
        return pl.BlockSpec((n, D), lambda i: (i, 0))

    def diag(rq, rk):
        return pl.BlockSpec((rq, rk), lambda i: (i, i))

    def full(a):
        return pl.BlockSpec(a.shape, lambda i: (0, 0))

    kernel = functools.partial(_decoder_layer_kernel,
                               n_head=n_head, d_k=d_k, d_v=d_v)
    out = pl.pallas_call(
        kernel,
        out_shape=jax.ShapeDtypeStruct((B * S, D), F32),
        grid=grid,
        in_specs=[rows(bb * S), rows(bb * S), rows(bb * Se),
                  diag(bb * S, bb * S), diag(bb * S, bb * Se), rows(bb * S),
                  full(wqkv_d), full(fc_d), full(pd['ln_g']), full(pd['ln_b']),
                  full(wq_e), full(wkv_e), full(fc_e),
                  full(pe['ln_g']), full(pe['ln_b']),
                  full(w1), full(pf['b1']), full(w2), full(pf['b2']),
                  full(pf['ln_g']), full(pf['ln_b'])],
        out_specs=rows(bb * S),
        compiler_params=pltpu.CompilerParams(dimension_semantics=("parallel",)),
    )(ha2, hs2, enc2, sbias, cbias, pos2,
      wqkv_d, fc_d, pd['ln_g'], pd['ln_b'],
      wq_e, wkv_e, fc_e, pe['ln_g'], pe['ln_b'],
      w1, pf['b1'], w2, pf['b2'], pf['ln_g'], pf['ln_b'])
    return out.reshape(B, S, D)


# -------------------------- params / reference (glue) --------------------------

def sinusoid_table(n_position, d_hid):
    pos = np.arange(n_position, dtype=np.float64)[:, None]
    j = np.arange(d_hid)[None, :]
    angle = pos / np.power(10000.0, 2.0 * (j // 2) / d_hid)
    tab = np.zeros((n_position, d_hid), dtype=np.float64)
    tab[:, 0::2] = np.sin(angle[:, 0::2])
    tab[:, 1::2] = np.cos(angle[:, 1::2])
    return jnp.asarray(tab, F32)


def init_params(key, d_model, d_inner, n_head, d_k, d_v):
    ks = jax.random.split(key, 12)
    w = lambda k, shape: 0.05 * jax.random.normal(k, shape, F32)
    ln = lambda: (jnp.ones((1, d_model), F32), jnp.zeros((1, d_model), F32))
    g1, b1 = ln(); g2, b2 = ln(); g3, b3 = ln()
    return {
        'dec': dict(wq=w(ks[0], (d_model, n_head * d_k)),
                    wk=w(ks[1], (d_model, n_head * d_k)),
                    wv=w(ks[2], (d_model, n_head * d_v)),
                    fc=w(ks[3], (n_head * d_v, d_model)),
                    ln_g=g1, ln_b=b1),
        'encdec': dict(wq=w(ks[4], (d_model, n_head * d_k)),
                       wk=w(ks[5], (d_model, n_head * d_k)),
                       wv=w(ks[6], (d_model, n_head * d_v)),
                       fc=w(ks[7], (n_head * d_v, d_model)),
                       ln_g=g2, ln_b=b2),
        'ffn': dict(w1=w(ks[8], (d_model, d_inner)),
                    b1=0.05 * jax.random.normal(ks[9], (1, d_inner), F32),
                    w2=w(ks[10], (d_inner, d_model)),
                    b2=0.05 * jax.random.normal(ks[11], (1, d_model), F32),
                    ln_g=g3, ln_b=b3),
    }


def decoder_layer_reference(h_a, h_s, enc, slf_mask, cross_mask, params, pos_table,
                            *, encode_length, n_head, d_k, d_v):
    """Pure-JAX reference mirroring the PyTorch forward (4-term type-area scores)."""
    def ln(x, g, b):
        mu = x.mean(-1, keepdims=True)
        var = ((x - mu) ** 2).mean(-1, keepdims=True)
        return (x - mu) / jnp.sqrt(var + LN_EPS) * g + b

    def heads(x, dh):
        B, S, _ = x.shape
        return x.reshape(B, S, n_head, dh).transpose(0, 2, 1, 3)

    B, S, D = h_a.shape
    pos = pos_table[encode_length:encode_length + S]
    a, s = h_a + pos[None], h_s + pos[None]
    scale = 1.0 / np.sqrt(d_k)

    p = params['dec']
    qa, ka, va = heads(a @ p['wq'], d_k), heads(a @ p['wk'], d_k), heads(a @ p['wv'], d_v)
    qs, ks, vs = heads(s @ p['wq'], d_k), heads(s @ p['wk'], d_k), heads(s @ p['wv'], d_v)
    sc = (jnp.einsum('bhqd,bhkd->bhqk', qa, ka) + jnp.einsum('bhqd,bhkd->bhqk', qs, ks)
          + jnp.einsum('bhqd,bhkd->bhqk', qa, ks) + jnp.einsum('bhqd,bhkd->bhqk', qs, ka)) * scale
    sc = jnp.where(slf_mask[:, None] == 0, NEG_INF, sc)
    o = jnp.einsum('bhqk,bhkd->bhqd', jax.nn.softmax(sc, -1), va + vs)
    o = o.transpose(0, 2, 1, 3).reshape(B, S, n_head * d_v) @ p['fc']
    x = ln(o + a + s, p['ln_g'], p['ln_b'])

    p = params['encdec']
    q, k, v = heads(x @ p['wq'], d_k), heads(enc @ p['wk'], d_k), heads(enc @ p['wv'], d_v)
    sc = jnp.einsum('bhqd,bhkd->bhqk', q, k) * scale
    sc = jnp.where(cross_mask[:, None] == 0, NEG_INF, sc)
    o = jnp.einsum('bhqk,bhkd->bhqd', jax.nn.softmax(sc, -1), v)
    o = o.transpose(0, 2, 1, 3).reshape(B, S, n_head * d_v) @ p['fc']
    x = ln(o + x, p['ln_g'], p['ln_b'])

    p = params['ffn']
    y = jnp.maximum(x @ p['w1'] + p['b1'], 0.0) @ p['w2'] + p['b2']
    return ln(y + x, p['ln_g'], p['ln_b'])


# ------------------------------------ main ------------------------------------

if __name__ == "__main__":
    B, S_dec, S_enc = 2, 8, 8
    d_model, d_inner, n_head, d_k, d_v = 32, 64, 2, 16, 16
    encode_length, max_ball_round = 4, 16          # config['encode_length'], config['max_ball_round']

    key = jax.random.PRNGKey(0)
    k_in, k_par = jax.random.split(key)
    k0, k1, k2 = jax.random.split(k_in, 3)

    h_a = jax.random.normal(k0, (B, S_dec, d_model), F32)
    h_s = jax.random.normal(k1, (B, S_dec, d_model), F32)
    encode_output = jax.random.normal(k2, (B, S_enc, d_model), F32)

    # masks: 1 = attend, 0 = masked (matches masked_fill(mask == 0, -1e9))
    slf_attn_mask = jnp.broadcast_to(jnp.tril(jnp.ones((S_dec, S_dec), F32)),
                                     (B, S_dec, S_dec))
    dec_enc_attn_mask = jnp.ones((B, S_dec, S_enc), F32)

    params = init_params(k_par, d_model, d_inner, n_head, d_k, d_v)
    pos_table = sinusoid_table(max_ball_round, d_model)        # shot_dim == d_model

    out = decoder_layer(h_a, h_s, encode_output, slf_attn_mask, dec_enc_attn_mask,
                        params, pos_table,
                        encode_length=encode_length, n_head=n_head, d_k=d_k, d_v=d_v)
    out = jax.block_until_ready(out)

    with jax.default_matmul_precision("highest"):
        ref = decoder_layer_reference(h_a, h_s, encode_output, slf_attn_mask,
                                      dec_enc_attn_mask, params, pos_table,
                                      encode_length=encode_length,
                                      n_head=n_head, d_k=d_k, d_v=d_v)
    np.testing.assert_allclose(np.asarray(out), np.asarray(ref), atol=5e-2, rtol=5e-2)

    print("KERNEL_OK")
</pallas_src>

<mosaic_0001>
module attributes {stable_mosaic.version = 11 : i64} {
  func.func @_decoder_layer_kernel(%arg0: i32, %arg1: memref<16x32xf32, #tpu.memory_space<vmem>>, %arg2: memref<16x32xf32, #tpu.memory_space<vmem>>, %arg3: memref<16x32xf32, #tpu.memory_space<vmem>>, %arg4: memref<16x16xf32, #tpu.memory_space<vmem>>, %arg5: memref<16x16xf32, #tpu.memory_space<vmem>>, %arg6: memref<16x32xf32, #tpu.memory_space<vmem>>, %arg7: memref<32x96xbf16, #tpu.memory_space<vmem>>, %arg8: memref<32x32xbf16, #tpu.memory_space<vmem>>, %arg9: memref<1x32xf32, #tpu.memory_space<vmem>>, %arg10: memref<1x32xf32, #tpu.memory_space<vmem>>, %arg11: memref<32x32xbf16, #tpu.memory_space<vmem>>, %arg12: memref<32x64xbf16, #tpu.memory_space<vmem>>, %arg13: memref<32x32xbf16, #tpu.memory_space<vmem>>, %arg14: memref<1x32xf32, #tpu.memory_space<vmem>>, %arg15: memref<1x32xf32, #tpu.memory_space<vmem>>, %arg16: memref<32x64xbf16, #tpu.memory_space<vmem>>, %arg17: memref<1x64xf32, #tpu.memory_space<vmem>>, %arg18: memref<64x32xbf16, #tpu.memory_space<vmem>>, %arg19: memref<1x32xf32, #tpu.memory_space<vmem>>, %arg20: memref<1x32xf32, #tpu.memory_space<vmem>>, %arg21: memref<1x32xf32, #tpu.memory_space<vmem>>, %arg22: memref<16x32xf32, #tpu.memory_space<vmem>>) attributes {dimension_semantics = [#tpu.dimension_semantics<parallel>], iteration_bounds = array<i64: 1>, scalar_prefetch = 0 : i64, scratch_operands = 0 : i64, tpu.core_type = #tpu.core_type<tc>, window_params = [{transform_indices = @transform_0, window_bounds = array<i64: 16, 32>}, {transform_indices = @transform_1, window_bounds = array<i64: 16, 32>}, {transform_indices = @transform_2, window_bounds = array<i64: 16, 32>}, {transform_indices = @transform_3, window_bounds = array<i64: 16, 16>}, {transform_indices = @transform_4, window_bounds = array<i64: 16, 16>}, {transform_indices = @transform_5, window_bounds = array<i64: 16, 32>}, {pipeline_mode = #tpu.pipeline_mode<synchronous>, transform_indices = @transform_6, window_bounds = array<i64: 32, 96>}, {pipeline_mode = #tpu.pipeline_mode<synchronous>, transform_indices = @transform_7, window_bounds = array<i64: 32, 32>}, {pipeline_mode = #tpu.pipeline_mode<synchronous>, transform_indices = @transform_8, window_bounds = array<i64: 1, 32>}, {pipeline_mode = #tpu.pipeline_mode<synchronous>, transform_indices = @transform_9, window_bounds = array<i64: 1, 32>}, {pipeline_mode = #tpu.pipeline_mode<synchronous>, transform_indices = @transform_10, window_bounds = array<i64: 32, 32>}, {pipeline_mode = #tpu.pipeline_mode<synchronous>, transform_indices = @transform_11, window_bounds = array<i64: 32, 64>}, {pipeline_mode = #tpu.pipeline_mode<synchronous>, transform_indices = @transform_12, window_bounds = array<i64: 32, 32>}, {pipeline_mode = #tpu.pipeline_mode<synchronous>, transform_indices = @transform_13, window_bounds = array<i64: 1, 32>}, {pipeline_mode = #tpu.pipeline_mode<synchronous>, transform_indices = @transform_14, window_bounds = array<i64: 1, 32>}, {pipeline_mode = #tpu.pipeline_mode<synchronous>, transform_indices = @transform_15, window_bounds = array<i64: 32, 64>}, {pipeline_mode = #tpu.pipeline_mode<synchronous>, transform_indices = @transform_16, window_bounds = array<i64: 1, 64>}, {pipeline_mode = #tpu.pipeline_mode<synchronous>, transform_indices = @transform_17, window_bounds = array<i64: 64, 32>}, {pipeline_mode = #tpu.pipeline_mode<synchronous>, transform_indices = @transform_18, window_bounds = array<i64: 1, 32>}, {pipeline_mode = #tpu.pipeline_mode<synchronous>, transform_indices = @transform_19, window_bounds = array<i64: 1, 32>}, {pipeline_mode = #tpu.pipeline_mode<synchronous>, transform_indices = @transform_20, window_bounds = array<i64: 1, 32>}, {transform_indices = @transform_21, window_bounds = array<i64: 16, 32>}]} {
    %c0 = arith.constant 0 : index
    %c0_0 = arith.constant 0 : index
    %0 = vector.load %arg1[%c0, %c0_0] : memref<16x32xf32, #tpu.memory_space<vmem>>, vector<16x32xf32>
    %c0_1 = arith.constant 0 : index
    %c0_2 = arith.constant 0 : index
    %1 = vector.load %arg2[%c0_1, %c0_2] : memref<16x32xf32, #tpu.memory_space<vmem>>, vector<16x32xf32>
    %2 = arith.addf %0, %1 : vector<16x32xf32>
    %c0_3 = arith.constant 0 : index
    %c0_4 = arith.constant 0 : index
    %3 = vector.load %arg6[%c0_3, %c0_4] : memref<16x32xf32, #tpu.memory_space<vmem>>, vector<16x32xf32>
    %cst = arith.constant 2.000000e+00 : f32
    %4 = vector.broadcast %cst : f32 to vector<16x32xf32>
    %5 = arith.mulf %4, %3 : vector<16x32xf32>
    %6 = arith.addf %2, %5 : vector<16x32xf32>
    %7 = arith.truncf %6 : vector<16x32xf32> to vector<16x32xbf16>
    %c0_5 = arith.constant 0 : index
    %c0_6 = arith.constant 0 : index
    %8 = vector.load %arg7[%c0_5, %c0_6] : memref<32x96xbf16, #tpu.memory_space<vmem>>, vector<32x96xbf16>
    %cst_7 = arith.constant dense<0.000000e+00> : vector<16x96xf32>
    %9 = tpu.matmul %7, %8, %cst_7 {dimension_numbers = #tpu.dot_dimension_numbers<[1], [0], [0], [1], [0, 0, 1, 1], [], []>} : vector<16x32xbf16>, vector<32x96xbf16>, vector<16x96xf32> -> vector<16x96xf32>
    %10 = vector.extract_strided_slice %9 {offsets = [0, 0], sizes = [16, 32], strides = [1, 1]} : vector<16x96xf32> to vector<16x32xf32>
    %11 = vector.extract_strided_slice %9 {offsets = [0, 32], sizes = [16, 32], strides = [1, 1]} : vector<16x96xf32> to vector<16x32xf32>
    %12 = vector.extract_strided_slice %9 {offsets = [0, 64], sizes = [16, 32], strides = [1, 1]} : vector<16x96xf32> to vector<16x32xf32>
    %c0_8 = arith.constant 0 : index
    %c0_9 = arith.constant 0 : index
    %13 = vector.load %arg4[%c0_8, %c0_9] : memref<16x16xf32, #tpu.memory_space<vmem>>, vector<16x16xf32>
    %c0_10 = arith.constant 0 : index
    %c0_11 = arith.constant 0 : index
    %14 = vector.load %arg8[%c0_10, %c0_11] : memref<32x32xbf16, #tpu.memory_space<vmem>>, vector<32x32xbf16>
    %15 = vector.extract_strided_slice %10 {offsets = [0, 0], sizes = [16, 16], strides = [1, 1]} : vector<16x32xf32> to vector<16x16xf32>
    %16 = arith.truncf %15 : vector<16x16xf32> to vector<16x16xbf16>
    %17 = vector.extract_strided_slice %11 {offsets = [0, 0], sizes = [16, 16], strides = [1, 1]} : vector<16x32xf32> to vector<16x16xf32>
    %18 = arith.truncf %17 : vector<16x16xf32> to vector<16x16xbf16>
    %19 = vector.extract_strided_slice %12 {offsets = [0, 0], sizes = [16, 16], strides = [1, 1]} : vector<16x32xf32> to vector<16x16xf32>
    %20 = arith.truncf %19 : vector<16x16xf32> to vector<16x16xbf16>
    "tpu.trace_start"() <{level = 10 : i32, message = "qd,kd->qk"}> : () -> ()
    %cst_12 = arith.constant dense<0.000000e+00> : vector<16x16xf32>
    %21 = tpu.matmul %16, %18, %cst_12 {dimension_numbers = #tpu.dot_dimension_numbers<[1], [1], [0], [0], [0, 0, 1, 0], [], []>} : vector<16x16xbf16>, vector<16x16xbf16>, vector<16x16xf32> -> vector<16x16xf32>
    "tpu.trace_stop"() : () -> ()
    %cst_13 = arith.constant 2.500000e-01 : f32
    %22 = vector.broadcast %cst_13 : f32 to vector<16x16xf32>
    %23 = arith.mulf %21, %22 : vector<16x16xf32>
    %24 = arith.addf %23, %13 : vector<16x16xf32>
    %cst_14 = arith.constant dense<0xFF800000> : vector<16xf32>
    %25 = vector.multi_reduction <maximumf>, %24, %cst_14 [1] : vector<16x16xf32> to vector<16xf32>
    %26 = vector.shape_cast %25 : vector<16xf32> to vector<16x1xf32>
    %27 = vector.broadcast %26 : vector<16x1xf32> to vector<16x16xf32>
    %28 = arith.subf %24, %27 : vector<16x16xf32>
    %29 = math.exp %28 : vector<16x16xf32>
    %cst_15 = arith.constant dense<0.000000e+00> : vector<16xf32>
    %30 = vector.multi_reduction <add>, %29, %cst_15 [1] : vector<16x16xf32> to vector<16xf32>
    %31 = vector.shape_cast %30 : vector<16xf32> to vector<16x1xf32>
    %32 = tpu.reciprocal %31 {approx = true} : vector<16x1xf32> -> vector<16x1xf32>
    %33 = vector.broadcast %32 : vector<16x1xf32> to vector<16x16xf32>
    %34 = arith.mulf %29, %33 : vector<16x16xf32>
    %35 = arith.truncf %34 : vector<16x16xf32> to vector<16x16xbf16>
    %cst_16 = arith.constant dense<0.000000e+00> : vector<16x16xf32>
    %36 = tpu.matmul %35, %20, %cst_16 {dimension_numbers = #tpu.dot_dimension_numbers<[1], [0], [0], [1], [0, 0, 1, 1], [], []>} : vector<16x16xbf16>, vector<16x16xbf16>, vector<16x16xf32> -> vector<16x16xf32>
    %37 = arith.truncf %36 : vector<16x16xf32> to vector<16x16xbf16>
    %38 = vector.extract_strided_slice %14 {offsets = [0, 0], sizes = [16, 32], strides = [1, 1]} : vector<32x32xbf16> to vector<16x32xbf16>
    %cst_17 = arith.constant dense<0.000000e+00> : vector<16x32xf32>
    %39 = tpu.matmul %37, %38, %cst_17 {dimension_numbers = #tpu.dot_dimension_numbers<[1], [0], [0], [1], [0, 0, 1, 1], [], []>} : vector<16x16xbf16>, vector<16x32xbf16>, vector<16x32xf32> -> vector<16x32xf32>
    %40 = vector.extract_strided_slice %10 {offsets = [0, 16], sizes = [16, 16], strides = [1, 1]} : vector<16x32xf32> to vector<16x16xf32>
    %41 = arith.truncf %40 : vector<16x16xf32> to vector<16x16xbf16>
    %42 = vector.extract_strided_slice %11 {offsets = [0, 16], sizes = [16, 16], strides = [1, 1]} : vector<16x32xf32> to vector<16x16xf32>
    %43 = arith.truncf %42 : vector<16x16xf32> to vector<16x16xbf16>
    %44 = vector.extract_strided_slice %12 {offsets = [0, 16], sizes = [16, 16], strides = [1, 1]} : vector<16x32xf32> to vector<16x16xf32>
    %45 = arith.truncf %44 : vector<16x16xf32> to vector<16x16xbf16>
    "tpu.trace_start"() <{level = 10 : i32, message = "qd,kd->qk"}> : () -> ()
    %cst_18 = arith.constant dense<0.000000e+00> : vector<16x16xf32>
    %46 = tpu.matmul %41, %43, %cst_18 {dimension_numbers = #tpu.dot_dimension_numbers<[1], [1], [0], [0], [0, 0, 1, 0], [], []>} : vector<16x16xbf16>, vector<16x16xbf16>, vector<16x16xf32> -> vector<16x16xf32>
    "tpu.trace_stop"() : () -> ()
    %cst_19 = arith.constant 2.500000e-01 : f32
    %47 = vector.broadcast %cst_19 : f32 to vector<16x16xf32>
    %48 = arith.mulf %46, %47 : vector<16x16xf32>
    %49 = arith.addf %48, %13 : vector<16x16xf32>
    %cst_20 = arith.constant dense<0xFF800000> : vector<16xf32>
    %50 = vector.multi_reduction <maximumf>, %49, %cst_20 [1] : vector<16x16xf32> to vector<16xf32>
    %51 = vector.shape_cast %50 : vector<16xf32> to vector<16x1xf32>
    %52 = vector.broadcast %51 : vector<16x1xf32> to vector<16x16xf32>
    %53 = arith.subf %49, %52 : vector<16x16xf32>
    %54 = math.exp %53 : vector<16x16xf32>
    %cst_21 = arith.constant dense<0.000000e+00> : vector<16xf32>
    %55 = vector.multi_reduction <add>, %54, %cst_21 [1] : vector<16x16xf32> to vector<16xf32>
    %56 = vector.shape_cast %55 : vector<16xf32> to vector<16x1xf32>
    %57 = tpu.reciprocal %56 {approx = true} : vector<16x1xf32> -> vector<16x1xf32>
    %58 = vector.broadcast %57 : vector<16x1xf32> to vector<16x16xf32>
    %59 = arith.mulf %54, %58 : vector<16x16xf32>
    %60 = arith.truncf %59 : vector<16x16xf32> to vector<16x16xbf16>
    %cst_22 = arith.constant dense<0.000000e+00> : vector<16x16xf32>
    %61 = tpu.matmul %60, %45, %cst_22 {dimension_numbers = #tpu.dot_dimension_numbers<[1], [0], [0], [1], [0, 0, 1, 1], [], []>} : vector<16x16xbf16>, vector<16x16xbf16>, vector<16x16xf32> -> vector<16x16xf32>
    %62 = arith.truncf %61 : vector<16x16xf32> to vector<16x16xbf16>
    %63 = vector.extract_strided_slice %14 {offsets = [16, 0], sizes = [16, 32], strides = [1, 1]} : vector<32x32xbf16> to vector<16x32xbf16>
    %cst_23 = arith.constant dense<0.000000e+00> : vector<16x32xf32>
    %64 = tpu.matmul %62, %63, %cst_23 {dimension_numbers = #tpu.dot_dimension_numbers<[1], [0], [0], [1], [0, 0, 1, 1], [], []>} : vector<16x16xbf16>, vector<16x32xbf16>, vector<16x32xf32> -> vector<16x32xf32>
    %65 = arith.addf %39, %64 : vector<16x32xf32>
    %66 = arith.addf %65, %6 : vector<16x32xf32>
    %c0_24 = arith.constant 0 : index
    %c0_25 = arith.constant 0 : index
    %67 = vector.load %arg9[%c0_24, %c0_25] : memref<1x32xf32, #tpu.memory_space<vmem>>, vector<1x32xf32>
    %c0_26 = arith.constant 0 : index
    %c0_27 = arith.constant 0 : index
    %68 = vector.load %arg10[%c0_26, %c0_27] : memref<1x32xf32, #tpu.memory_space<vmem>>, vector<1x32xf32>
    %cst_28 = arith.constant dense<0.000000e+00> : vector<16xf32>
    %69 = vector.multi_reduction <add>, %66, %cst_28 [1] : vector<16x32xf32> to vector<16xf32>
    %70 = vector.shape_cast %69 : vector<16xf32> to vector<16x1xf32>
    %cst_29 = arith.constant 3.200000e+01 : f32
    %71 = vector.broadcast %cst_29 : f32 to vector<16x1xf32>
    %72 = arith.divf %70, %71 : vector<16x1xf32>
    %73 = vector.broadcast %72 : vector<16x1xf32> to vector<16x32xf32>
    %74 = arith.subf %66, %73 : vector<16x32xf32>
    %75 = arith.mulf %74, %74 : vector<16x32xf32>
    %cst_30 = arith.constant dense<0.000000e+00> : vector<16xf32>
    %76 = vector.multi_reduction <add>, %75, %cst_30 [1] : vector<16x32xf32> to vector<16xf32>
    %77 = vector.shape_cast %76 : vector<16xf32> to vector<16x1xf32>
    %cst_31 = arith.constant 3.200000e+01 : f32
    %78 = vector.broadcast %cst_31 : f32 to vector<16x1xf32>
    %79 = arith.divf %77, %78 : vector<16x1xf32>
    %80 = vector.broadcast %72 : vector<16x1xf32> to vector<16x32xf32>
    %81 = arith.subf %66, %80 : vector<16x32xf32>
    %cst_32 = arith.constant 9.99999997E-7 : f32
    %82 = vector.broadcast %cst_32 : f32 to vector<16x1xf32>
    %83 = arith.addf %79, %82 : vector<16x1xf32>
    %84 = math.rsqrt %83 : vector<16x1xf32>
    %85 = vector.broadcast %84 : vector<16x1xf32> to vector<16x32xf32>
    %86 = arith.mulf %81, %85 : vector<16x32xf32>
    %87 = vector.broadcast %67 : vector<1x32xf32> to vector<16x32xf32>
    %88 = arith.mulf %86, %87 : vector<16x32xf32>
    %89 = vector.broadcast %68 : vector<1x32xf32> to vector<16x32xf32>
    %90 = arith.addf %88, %89 : vector<16x32xf32>
    %91 = arith.truncf %90 : vector<16x32xf32> to vector<16x32xbf16>
    %c0_33 = arith.constant 0 : index
    %c0_34 = arith.constant 0 : index
    %92 = vector.load %arg11[%c0_33, %c0_34] : memref<32x32xbf16, #tpu.memory_space<vmem>>, vector<32x32xbf16>
    %cst_35 = arith.constant dense<0.000000e+00> : vector<16x32xf32>
    %93 = tpu.matmul %91, %92, %cst_35 {dimension_numbers = #tpu.dot_dimension_numbers<[1], [0], [0], [1], [0, 0, 1, 1], [], []>} : vector<16x32xbf16>, vector<32x32xbf16>, vector<16x32xf32> -> vector<16x32xf32>
    %c0_36 = arith.constant 0 : index
    %c0_37 = arith.constant 0 : index
    %94 = vector.load %arg3[%c0_36, %c0_37] : memref<16x32xf32, #tpu.memory_space<vmem>>, vector<16x32xf32>
    %95 = arith.truncf %94 : vector<16x32xf32> to vector<16x32xbf16>
    %c0_38 = arith.constant 0 : index
    %c0_39 = arith.constant 0 : index
    %96 = vector.load %arg12[%c0_38, %c0_39] : memref<32x64xbf16, #tpu.memory_space<vmem>>, vector<32x64xbf16>
    %cst_40 = arith.constant dense<0.000000e+00> : vector<16x64xf32>
    %97 = tpu.matmul %95, %96, %cst_40 {dimension_numbers = #tpu.dot_dimension_numbers<[1], [0], [0], [1], [0, 0, 1, 1], [], []>} : vector<16x32xbf16>, vector<32x64xbf16>, vector<16x64xf32> -> vector<16x64xf32>
    %98 = vector.extract_strided_slice %97 {offsets = [0, 0], sizes = [16, 32], strides = [1, 1]} : vector<16x64xf32> to vector<16x32xf32>
    %99 = vector.extract_strided_slice %97 {offsets = [0, 32], sizes = [16, 32], strides = [1, 1]} : vector<16x64xf32> to vector<16x32xf32>
    %c0_41 = arith.constant 0 : index
    %c0_42 = arith.constant 0 : index
    %100 = vector.load %arg5[%c0_41, %c0_42] : memref<16x16xf32, #tpu.memory_space<vmem>>, vector<16x16xf32>
    %c0_43 = arith.constant 0 : index
    %c0_44 = arith.constant 0 : index
    %101 = vector.load %arg13[%c0_43, %c0_44] : memref<32x32xbf16, #tpu.memory_space<vmem>>, vector<32x32xbf16>
    %102 = vector.extract_strided_slice %93 {offsets = [0, 0], sizes = [16, 16], strides = [1, 1]} : vector<16x32xf32> to vector<16x16xf32>
    %103 = arith.truncf %102 : vector<16x16xf32> to vector<16x16xbf16>
    %104 = vector.extract_strided_slice %98 {offsets = [0, 0], sizes = [16, 16], strides = [1, 1]} : vector<16x32xf32> to vector<16x16xf32>
    %105 = arith.truncf %104 : vector<16x16xf32> to vector<16x16xbf16>
    %106 = vector.extract_strided_slice %99 {offsets = [0, 0], sizes = [16, 16], strides = [1, 1]} : vector<16x32xf32> to vector<16x16xf32>
    %107 = arith.truncf %106 : vector<16x16xf32> to vector<16x16xbf16>
    "tpu.trace_start"() <{level = 10 : i32, message = "qd,kd->qk"}> : () -> ()
    %cst_45 = arith.constant dense<0.000000e+00> : vector<16x16xf32>
    %108 = tpu.matmul %103, %105, %cst_45 {dimension_numbers = #tpu.dot_dimension_numbers<[1], [1], [0], [0], [0, 0, 1, 0], [], []>} : vector<16x16xbf16>, vector<16x16xbf16>, vector<16x16xf32> -> vector<16x16xf32>
    "tpu.trace_stop"() : () -> ()
    %cst_46 = arith.constant 2.500000e-01 : f32
    %109 = vector.broadcast %cst_46 : f32 to vector<16x16xf32>
    %110 = arith.mulf %108, %109 : vector<16x16xf32>
    %111 = arith.addf %110, %100 : vector<16x16xf32>
    %cst_47 = arith.constant dense<0xFF800000> : vector<16xf32>
    %112 = vector.multi_reduction <maximumf>, %111, %cst_47 [1] : vector<16x16xf32> to vector<16xf32>
    %113 = vector.shape_cast %112 : vector<16xf32> to vector<16x1xf32>
    %114 = vector.broadcast %113 : vector<16x1xf32> to vector<16x16xf32>
    %115 = arith.subf %111, %114 : vector<16x16xf32>
    %116 = math.exp %115 : vector<16x16xf32>
    %cst_48 = arith.constant dense<0.000000e+00> : vector<16xf32>
    %117 = vector.multi_reduction <add>, %116, %cst_48 [1] : vector<16x16xf32> to vector<16xf32>
    %118 = vector.shape_cast %117 : vector<16xf32> to vector<16x1xf32>
    %119 = tpu.reciprocal %118 {approx = true} : vector<16x1xf32> -> vector<16x1xf32>
    %120 = vector.broadcast %119 : vector<16x1xf32> to vector<16x16xf32>
    %121 = arith.mulf %116, %120 : vector<16x16xf32>
    %122 = arith.truncf %121 : vector<16x16xf32> to vector<16x16xbf16>
    %cst_49 = arith.constant dense<0.000000e+00> : vector<16x16xf32>
    %123 = tpu.matmul %122, %107, %cst_49 {dimension_numbers = #tpu.dot_dimension_numbers<[1], [0], [0], [1], [0, 0, 1, 1], [], []>} : vector<16x16xbf16>, vector<16x16xbf16>, vector<16x16xf32> -> vector<16x16xf32>
    %124 = arith.truncf %123 : vector<16x16xf32> to vector<16x16xbf16>
    %125 = vector.extract_strided_slice %101 {offsets = [0, 0], sizes = [16, 32], strides = [1, 1]} : vector<32x32xbf16> to vector<16x32xbf16>
    %cst_50 = arith.constant dense<0.000000e+00> : vector<16x32xf32>
    %126 = tpu.matmul %124, %125, %cst_50 {dimension_numbers = #tpu.dot_dimension_numbers<[1], [0], [0], [1], [0, 0, 1, 1], [], []>} : vector<16x16xbf16>, vector<16x32xbf16>, vector<16x32xf32> -> vector<16x32xf32>
    %127 = vector.extract_strided_slice %93 {offsets = [0, 16], sizes = [16, 16], strides = [1, 1]} : vector<16x32xf32> to vector<16x16xf32>
    %128 = arith.truncf %127 : vector<16x16xf32> to vector<16x16xbf16>
    %129 = vector.extract_strided_slice %98 {offsets = [0, 16], sizes = [16, 16], strides = [1, 1]} : vector<16x32xf32> to vector<16x16xf32>
    %130 = arith.truncf %129 : vector<16x16xf32> to vector<16x16xbf16>
    %131 = vector.extract_strided_slice %99 {offsets = [0, 16], sizes = [16, 16], strides = [1, 1]} : vector<16x32xf32> to vector<16x16xf32>
    %132 = arith.truncf %131 : vector<16x16xf32> to vector<16x16xbf16>
    "tpu.trace_start"() <{level = 10 : i32, message = "qd,kd->qk"}> : () -> ()
    %cst_51 = arith.constant dense<0.000000e+00> : vector<16x16xf32>
    %133 = tpu.matmul %128, %130, %cst_51 {dimension_numbers = #tpu.dot_dimension_numbers<[1], [1], [0], [0], [0, 0, 1, 0], [], []>} : vector<16x16xbf16>, vector<16x16xbf16>, vector<16x16xf32> -> vector<16x16xf32>
    "tpu.trace_stop"() : () -> ()
    %cst_52 = arith.constant 2.500000e-01 : f32
    %134 = vector.broadcast %cst_52 : f32 to vector<16x16xf32>
    %135 = arith.mulf %133, %134 : vector<16x16xf32>
    %136 = arith.addf %135, %100 : vector<16x16xf32>
    %cst_53 = arith.constant dense<0xFF800000> : vector<16xf32>
    %137 = vector.multi_reduction <maximumf>, %136, %cst_53 [1] : vector<16x16xf32> to vector<16xf32>
    %138 = vector.shape_cast %137 : vector<16xf32> to vector<16x1xf32>
    %139 = vector.broadcast %138 : vector<16x1xf32> to vector<16x16xf32>
    %140 = arith.subf %136, %139 : vector<16x16xf32>
    %141 = math.exp %140 : vector<16x16xf32>
    %cst_54 = arith.constant dense<0.000000e+00> : vector<16xf32>
    %142 = vector.multi_reduction <add>, %141, %cst_54 [1] : vector<16x16xf32> to vector<16xf32>
    %143 = vector.shape_cast %142 : vector<16xf32> to vector<16x1xf32>
    %144 = tpu.reciprocal %143 {approx = true} : vector<16x1xf32> -> vector<16x1xf32>
    %145 = vector.broadcast %144 : vector<16x1xf32> to vector<16x16xf32>
    %146 = arith.mulf %141, %145 : vector<16x16xf32>
    %147 = arith.truncf %146 : vector<16x16xf32> to vector<16x16xbf16>
    %cst_55 = arith.constant dense<0.000000e+00> : vector<16x16xf32>
    %148 = tpu.matmul %147, %132, %cst_55 {dimension_numbers = #tpu.dot_dimension_numbers<[1], [0], [0], [1], [0, 0, 1, 1], [], []>} : vector<16x16xbf16>, vector<16x16xbf16>, vector<16x16xf32> -> vector<16x16xf32>
    %149 = arith.truncf %148 : vector<16x16xf32> to vector<16x16xbf16>
    %150 = vector.extract_strided_slice %101 {offsets = [16, 0], sizes = [16, 32], strides = [1, 1]} : vector<32x32xbf16> to vector<16x32xbf16>
    %cst_56 = arith.constant dense<0.000000e+00> : vector<16x32xf32>
    %151 = tpu.matmul %149, %150, %cst_56 {dimension_numbers = #tpu.dot_dimension_numbers<[1], [0], [0], [1], [0, 0, 1, 1], [], []>} : vector<16x16xbf16>, vector<16x32xbf16>, vector<16x32xf32> -> vector<16x32xf32>
    %152 = arith.addf %126, %151 : vector<16x32xf32>
    %153 = arith.addf %152, %90 : vector<16x32xf32>
    %c0_57 = arith.constant 0 : index
    %c0_58 = arith.constant 0 : index
    %154 = vector.load %arg14[%c0_57, %c0_58] : memref<1x32xf32, #tpu.memory_space<vmem>>, vector<1x32xf32>
    %c0_59 = arith.constant 0 : index
    %c0_60 = arith.constant 0 : index
    %155 = vector.load %arg15[%c0_59, %c0_60] : memref<1x32xf32, #tpu.memory_space<vmem>>, vector<1x32xf32>
    %cst_61 = arith.constant dense<0.000000e+00> : vector<16xf32>
    %156 = vector.multi_reduction <add>, %153, %cst_61 [1] : vector<16x32xf32> to vector<16xf32>
    %157 = vector.shape_cast %156 : vector<16xf32> to vector<16x1xf32>
    %cst_62 = arith.constant 3.200000e+01 : f32
    %158 = vector.broadcast %cst_62 : f32 to vector<16x1xf32>
    %159 = arith.divf %157, %158 : vector<16x1xf32>
    %160 = vector.broadcast %159 : vector<16x1xf32> to vector<16x32xf32>
    %161 = arith.subf %153, %160 : vector<16x32xf32>
    %162 = arith.mulf %161, %161 : vector<16x32xf32>
    %cst_63 = arith.constant dense<0.000000e+00> : vector<16xf32>
    %163 = vector.multi_reduction <add>, %162, %cst_63 [1] : vector<16x32xf32> to vector<16xf32>
    %164 = vector.shape_cast %163 : vector<16xf32> to vector<16x1xf32>
    %cst_64 = arith.constant 3.200000e+01 : f32
    %165 = vector.broadcast %cst_64 : f32 to vector<16x1xf32>
    %166 = arith.divf %164, %165 : vector<16x1xf32>
    %167 = vector.broadcast %159 : vector<16x1xf32> to vector<16x32xf32>
    %168 = arith.subf %153, %167 : vector<16x32xf32>
    %cst_65 = arith.constant 9.99999997E-7 : f32
    %169 = vector.broadcast %cst_65 : f32 to vector<16x1xf32>
    %170 = arith.addf %166, %169 : vector<16x1xf32>
    %171 = math.rsqrt %170 : vector<16x1xf32>
    %172 = vector.broadcast %171 : vector<16x1xf32> to vector<16x32xf32>
    %173 = arith.mulf %168, %172 : vector<16x32xf32>
    %174 = vector.broadcast %154 : vector<1x32xf32> to vector<16x32xf32>
    %175 = arith.mulf %173, %174 : vector<16x32xf32>
    %176 = vector.broadcast %155 : vector<1x32xf32> to vector<16x32xf32>
    %177 = arith.addf %175, %176 : vector<16x32xf32>
    %178 = arith.truncf %177 : vector<16x32xf32> to vector<16x32xbf16>
    %c0_66 = arith.constant 0 : index
    %c0_67 = arith.constant 0 : index
    %179 = vector.load %arg16[%c0_66, %c0_67] : memref<32x64xbf16, #tpu.memory_space<vmem>>, vector<32x64xbf16>
    %cst_68 = arith.constant dense<0.000000e+00> : vector<16x64xf32>
    %180 = tpu.matmul %178, %179, %cst_68 {dimension_numbers = #tpu.dot_dimension_numbers<[1], [0], [0], [1], [0, 0, 1, 1], [], []>} : vector<16x32xbf16>, vector<32x64xbf16>, vector<16x64xf32> -> vector<16x64xf32>
    %c0_69 = arith.constant 0 : index
    %c0_70 = arith.constant 0 : index
    %181 = vector.load %arg17[%c0_69, %c0_70] : memref<1x64xf32, #tpu.memory_space<vmem>>, vector<1x64xf32>
    %182 = vector.broadcast %181 : vector<1x64xf32> to vector<16x64xf32>
    %183 = arith.addf %180, %182 : vector<16x64xf32>
    %cst_71 = arith.constant 0.000000e+00 : f32
    %184 = vector.broadcast %cst_71 : f32 to vector<16x64xf32>
    %185 = arith.maximumf %183, %184 : vector<16x64xf32>
    %186 = arith.truncf %185 : vector<16x64xf32> to vector<16x64xbf16>
    %c0_72 = arith.constant 0 : index
    %c0_73 = arith.constant 0 : index
    %187 = vector.load %arg18[%c0_72, %c0_73] : memref<64x32xbf16, #tpu.memory_space<vmem>>, vector<64x32xbf16>
    %cst_74 = arith.constant dense<0.000000e+00> : vector<16x32xf32>
    %188 = tpu.matmul %186, %187, %cst_74 {dimension_numbers = #tpu.dot_dimension_numbers<[1], [0], [0], [1], [0, 0, 1, 1], [], []>} : vector<16x64xbf16>, vector<64x32xbf16>, vector<16x32xf32> -> vector<16x32xf32>
    %c0_75 = arith.constant 0 : index
    %c0_76 = arith.constant 0 : index
    %189 = vector.load %arg19[%c0_75, %c0_76] : memref<1x32xf32, #tpu.memory_space<vmem>>, vector<1x32xf32>
    %190 = vector.broadcast %189 : vector<1x32xf32> to vector<16x32xf32>
    %191 = arith.addf %188, %190 : vector<16x32xf32>
    %192 = arith.addf %191, %177 : vector<16x32xf32>
    %c0_77 = arith.constant 0 : index
    %c0_78 = arith.constant 0 : index
    %193 = vector.load %arg20[%c0_77, %c0_78] : memref<1x32xf32, #tpu.memory_space<vmem>>, vector<1x32xf32>
    %c0_79 = arith.constant 0 : index
    %c0_80 = arith.constant 0 : index
    %194 = vector.load %arg21[%c0_79, %c0_80] : memref<1x32xf32, #tpu.memory_space<vmem>>, vector<1x32xf32>
    %cst_81 = arith.constant dense<0.000000e+00> : vector<16xf32>
    %195 = vector.multi_reduction <add>, %192, %cst_81 [1] : vector<16x32xf32> to vector<16xf32>
    %196 = vector.shape_cast %195 : vector<16xf32> to vector<16x1xf32>
    %cst_82 = arith.constant 3.200000e+01 : f32
    %197 = vector.broadcast %cst_82 : f32 to vector<16x1xf32>
    %198 = arith.divf %196, %197 : vector<16x1xf32>
    %199 = vector.broadcast %198 : vector<16x1xf32> to vector<16x32xf32>
    %200 = arith.subf %192, %199 : vector<16x32xf32>
    %201 = arith.mulf %200, %200 : vector<16x32xf32>
    %cst_83 = arith.constant dense<0.000000e+00> : vector<16xf32>
    %202 = vector.multi_reduction <add>, %201, %cst_83 [1] : vector<16x32xf32> to vector<16xf32>
    %203 = vector.shape_cast %202 : vector<16xf32> to vector<16x1xf32>
    %cst_84 = arith.constant 3.200000e+01 : f32
    %204 = vector.broadcast %cst_84 : f32 to vector<16x1xf32>
    %205 = arith.divf %203, %204 : vector<16x1xf32>
    %206 = vector.broadcast %198 : vector<16x1xf32> to vector<16x32xf32>
    %207 = arith.subf %192, %206 : vector<16x32xf32>
    %cst_85 = arith.constant 9.99999997E-7 : f32
    %208 = vector.broadcast %cst_85 : f32 to vector<16x1xf32>
    %209 = arith.addf %205, %208 : vector<16x1xf32>
    %210 = math.rsqrt %209 : vector<16x1xf32>
    %211 = vector.broadcast %210 : vector<16x1xf32> to vector<16x32xf32>
    %212 = arith.mulf %207, %211 : vector<16x32xf32>
    %213 = vector.broadcast %193 : vector<1x32xf32> to vector<16x32xf32>
    %214 = arith.mulf %212, %213 : vector<16x32xf32>
    %215 = vector.broadcast %194 : vector<1x32xf32> to vector<16x32xf32>
    %216 = arith.addf %214, %215 : vector<16x32xf32>
    %c0_86 = arith.constant 0 : index
    %c0_87 = arith.constant 0 : index
    %217 = vector.load %arg22[%c0_86, %c0_87] : memref<16x32xf32, #tpu.memory_space<vmem>>, vector<16x32xf32>
    tpu.vector_store %arg22[%c0_86, %c0_87], %216 {strides = array<i32>} : memref<16x32xf32, #tpu.memory_space<vmem>>, vector<16x32xf32>,
    return
  }
  func.func @transform_0(%arg0: i32) -> (i32, i32) {
    %c0_i32 = arith.constant 0 : i32
    %c0_i32_0 = arith.constant 0 : i32
    return %arg0, %c0_i32 : i32, i32
  }
  func.func @transform_1(%arg0: i32) -> (i32, i32) {
    %c0_i32 = arith.constant 0 : i32
    %c0_i32_0 = arith.constant 0 : i32
    return %arg0, %c0_i32 : i32, i32
  }
  func.func @transform_2(%arg0: i32) -> (i32, i32) {
    %c0_i32 = arith.constant 0 : i32
    %c0_i32_0 = arith.constant 0 : i32
    return %arg0, %c0_i32 : i32, i32
  }
  func.func @transform_3(%arg0: i32) -> (i32, i32) {
    %c0_i32 = arith.constant 0 : i32
    return %arg0, %arg0 : i32, i32
  }
  func.func @transform_4(%arg0: i32) -> (i32, i32) {
    %c0_i32 = arith.constant 0 : i32
    return %arg0, %arg0 : i32, i32
  }
  func.func @transform_5(%arg0: i32) -> (i32, i32) {
    %c0_i32 = arith.constant 0 : i32
    %c0_i32_0 = arith.constant 0 : i32
    return %arg0, %c0_i32 : i32, i32
  }
  func.func @transform_6(%arg0: i32) -> (i32, i32) {
    %c0_i32 = arith.constant 0 : i32
    %c0_i32_0 = arith.constant 0 : i32
    %c0_i32_1 = arith.constant 0 : i32
    return %c0_i32, %c0_i32_0 : i32, i32
  }
  func.func @transform_7(%arg0: i32) -> (i32, i32) {
    %c0_i32 = arith.constant 0 : i32
    %c0_i32_0 = arith.constant 0 : i32
    %c0_i32_1 = arith.constant 0 : i32
    return %c0_i32, %c0_i32_0 : i32, i32
  }
  func.func @transform_8(%arg0: i32) -> (i32, i32) {
    %c0_i32 = arith.constant 0 : i32
    %c0_i32_0 = arith.constant 0 : i32
    %c0_i32_1 = arith.constant 0 : i32
    return %c0_i32, %c0_i32_0 : i32, i32
  }
  func.func @transform_9(%arg0: i32) -> (i32, i32) {
    %c0_i32 = arith.constant 0 : i32
    %c0_i32_0 = arith.constant 0 : i32
    %c0_i32_1 = arith.constant 0 : i32
    return %c0_i32, %c0_i32_0 : i32, i32
  }
  func.func @transform_10(%arg0: i32) -> (i32, i32) {
    %c0_i32 = arith.constant 0 : i32
    %c0_i32_0 = arith.constant 0 : i32
    %c0_i32_1 = arith.constant 0 : i32
    return %c0_i32, %c0_i32_0 : i32, i32
  }
  func.func @transform_11(%arg0: i32) -> (i32, i32) {
    %c0_i32 = arith.constant 0 : i32
    %c0_i32_0 = arith.constant 0 : i32
    %c0_i32_1 = arith.constant 0 : i32
    return %c0_i32, %c0_i32_0 : i32, i32
  }
  func.func @transform_12(%arg0: i32) -> (i32, i32) {
    %c0_i32 = arith.constant 0 : i32
    %c0_i32_0 = arith.constant 0 : i32
    %c0_i32_1 = arith.constant 0 : i32
    return %c0_i32, %c0_i32_0 : i32, i32
  }
  func.func @transform_13(%arg0: i32) -> (i32, i32) {
    %c0_i32 = arith.constant 0 : i32
    %c0_i32_0 = arith.constant 0 : i32
    %c0_i32_1 = arith.constant 0 : i32
    return %c0_i32, %c0_i32_0 : i32, i32
  }
  func.func @transform_14(%arg0: i32) -> (i32, i32) {
    %c0_i32 = arith.constant 0 : i32
    %c0_i32_0 = arith.constant 0 : i32
    %c0_i32_1 = arith.constant 0 : i32
    return %c0_i32, %c0_i32_0 : i32, i32
  }
  func.func @transform_15(%arg0: i32) -> (i32, i32) {
    %c0_i32 = arith.constant 0 : i32
    %c0_i32_0 = arith.constant 0 : i32
    %c0_i32_1 = arith.constant 0 : i32
    return %c0_i32, %c0_i32_0 : i32, i32
  }
  func.func @transform_16(%arg0: i32) -> (i32, i32) {
    %c0_i32 = arith.constant 0 : i32
    %c0_i32_0 = arith.constant 0 : i32
    %c0_i32_1 = arith.constant 0 : i32
    return %c0_i32, %c0_i32_0 : i32, i32
  }
  func.func @transform_17(%arg0: i32) -> (i32, i32) {
    %c0_i32 = arith.constant 0 : i32
    %c0_i32_0 = arith.constant 0 : i32
    %c0_i32_1 = arith.constant 0 : i32
    return %c0_i32, %c0_i32_0 : i32, i32
  }
  func.func @transform_18(%arg0: i32) -> (i32, i32) {
    %c0_i32 = arith.constant 0 : i32
    %c0_i32_0 = arith.constant 0 : i32
    %c0_i32_1 = arith.constant 0 : i32
    return %c0_i32, %c0_i32_0 : i32, i32
  }
  func.func @transform_19(%arg0: i32) -> (i32, i32) {
    %c0_i32 = arith.constant 0 : i32
    %c0_i32_0 = arith.constant 0 : i32
    %c0_i32_1 = arith.constant 0 : i32
    return %c0_i32, %c0_i32_0 : i32, i32
  }
  func.func @transform_20(%arg0: i32) -> (i32, i32) {
    %c0_i32 = arith.constant 0 : i32
    %c0_i32_0 = arith.constant 0 : i32
    %c0_i32_1 = arith.constant 0 : i32
    return %c0_i32, %c0_i32_0 : i32, i32
  }
  func.func @transform_21(%arg0: i32) -> (i32, i32) {
    %c0_i32 = arith.constant 0 : i32
    %c0_i32_0 = arith.constant 0 : i32
    return %arg0, %c0_i32 : i32, i32
  }
}

</mosaic_0001>

<bundles_post_ra>
// kernel: tpu_custom_call.1
= control target key start
LH: loop header
LB: loop body
LE: loop exit
PB: predicated region body
PF: predicated region fallthrough
CT: control target
= control target key end

     0   :  { %s2438_s0 = inlined_call_operand.vmem [shape: f32[16,32], index: 0, kind: input, shape index: {}]   ;;  %s2439_s1 = inlined_call_operand.vmem [shape: f32[16,32], index: 1, kind: input, shape index: {}]   ;;  %s2440_s2 = inlined_call_operand.vmem [shape: f32[16,32], index: 2, kind: input, shape index: {}]   ;;  %s2441_s3 = inlined_call_operand.hbm [shape: f32[16,16], index: 3, kind: input, shape index: {}]   ;;  %s2442_s4 = inlined_call_operand.hbm [shape: f32[16,16], index: 4, kind: input, shape index: {}]   ;;  %s2443_s5 = inlined_call_operand.hbm [shape: f32[16,32], index: 5, kind: input, shape index: {}]   ;;  %s2444_s6 = inlined_call_operand.hbm [shape: bf16[32,96], index: 6, kind: input, shape index: {}]   ;;  %s2445_s7 = inlined_call_operand.hbm [shape: bf16[32,32], index: 7, kind: input, shape index: {}]   ;;  %s2446_s8 = inlined_call_operand.vmem [shape: f32[1,32], index: 8, kind: input, shape index: {}]   ;;  %s2447_s9 = inlined_call_operand.hbm [shape: f32[1,32], index: 9, kind: input, shape index: {}]   ;;  %s2448_s10 = inlined_call_operand.vmem [shape: bf16[32,32], index: 10, kind: input, shape index: {}]   ;;  %s2449_s11 = inlined_call_operand.hbm [shape: bf16[32,64], index: 11, kind: input, shape index: {}]   ;;  %s2450_s12 = inlined_call_operand.hbm [shape: bf16[32,32], index: 12, kind: input, shape index: {}]   ;;  %s2451_s13 = inlined_call_operand.hbm [shape: f32[1,32], index: 13, kind: input, shape index: {}]   ;;  %s2452_s14 = inlined_call_operand.vmem [shape: f32[1,32], index: 14, kind: input, shape index: {}]   ;;  %s2453_s15 = inlined_call_operand.vmem [shape: bf16[32,64], index: 15, kind: input, shape index: {}]   ;;  %s2454_s16 = inlined_call_operand.vmem [shape: f32[1,64], index: 16, kind: input, shape index: {}]   ;;  %s2455_s17 = inlined_call_operand.vmem [shape: bf16[64,32], index: 17, kind: input, shape index: {}]   ;;  %s2456_s18 = inlined_call_operand.vmem [shape: f32[1,32], index: 18, kind: input, shape index: {}]   ;;  %s2457_s19 = inlined_call_operand.vmem [shape: f32[1,32], index: 19, kind: input, shape index: {}]   ;;  %s2458_s20 = inlined_call_operand.vmem [shape: f32[1,32], index: 20, kind: input, shape index: {}]   ;;  %s2459_s21 = inlined_call_operand.hbm [shape: f32[16,32], index: 21, kind: output, shape index: {}]  }
   0x1   :  { %2471 = sst [smem:[#allocation24_spill]] %s2438_s0 }
   0x2   :  { %2472 = sst [smem:[#allocation25_spill]] %s2439_s1 }
   0x3   :  { %2473 = sst [smem:[#allocation26_spill]] %s2440_s2 }
   0x4   :  { %2474 = sst [smem:[#allocation27_spill]] %s2441_s3 }
   0x5   :  { %2475 = sst [smem:[#allocation28_spill]] %s2442_s4 }
   0x6   :  { %2476 = sst [smem:[#allocation29_spill]] %s2443_s5 }
   0x7   :  { %2477 = sst [smem:[#allocation30_spill]] %s2459_s21 }
   0x8   :  { %26 = vsyncpa [#allocation3], 0 }
   0x9   :  { %27 = vsyncpa [#allocation6], 0 }
   0xa   :  { %28 = vsyncpa [#allocation9], 0 }
   0xb   :  { %29 = vsyncpa [#allocation12], 0 }
   0xc   :  { %30 = vsyncpa [#allocation15], 0 }
   0xd   :  { %31 = vsyncpa [#allocation4], 0  ;;  %s1930_s2 = smov [#allocation5]   ;;  %s1931_s26 = smov [#allocation8]  }
   0xe   :  { %s55_s25 = sshll.u32 %s1930_s2, 4  ;;  %s79_s27 = sshll.u32 %s1931_s26, 4  ;;  %s56_s25 = int_to_ptr.vmem [resolvable:$true] %s55_s25  ;;  %s2060_s27 = int_to_ptr.vmem [resolvable:$true] %s79_s27 }
   0xf   :  { %s2478_s29 = sld [smem:[#allocation28_spill]] }
  0x15   :  { %s1698_s0 = scalar_lea.hbm %s2478_s29, 256 }
  0x16   :  { %p1699_p0 = scmp.ne.s32.totalorder %s2478_s29, %s1698_s0  ;;  %p1702_p1 = scmp.lt.u32.totalorder %s1698_s0, %s2478_s29 }
  0x18   :  { %p1704_p2 = pnand %p1702_p1, %p1699_p0 }
  0x1a   :  { %1707 = shalt.err (!%p1704_p2)
}
  0x1b   :  { %s1708_s23 = scalar_lea.vmem %s56_s25, 256  ;;  %p1713_p4 = scmp.lt.s32.totalorder %s56_s25, %s56_s25 }
  0x1c   :  { %p1709_p3 = scmp.ne.s32.totalorder %s56_s25, %s1708_s23  ;;  %p1714_p5 = scmp.lt.s32.totalorder %s1708_s23, %s1708_s23 }
  0x1e   :  { %p1715_p6 = por %p1714_p5, %p1713_p4 }
  0x20   :  { %p1716_p7 = pnand %p1715_p6, %p1709_p3 }
  0x22   :  { %1719 = shalt.err (!%p1716_p7)
}
  0x23   :  { %s2466_s1 = smov 128   ;;  %s2468_s24 = smov 8  }
  0x24   :  { %61 = dma.hbm_to_vmem [thread:$0]  %s2478_s29, 256, %s56_s25, [#allocation6], %s2466_s1, %s2466_s1, %s2468_s24  }
  0x25   :  { %s1720_s0 = scalar_lea.hbm %s2444_s6, 256 }
  0x26   :  { %p1721_p8 = scmp.ne.s32.totalorder %s2444_s6, %s1720_s0  ;;  %p1724_p9 = scmp.lt.u32.totalorder %s1720_s0, %s2444_s6 }
  0x28   :  { %p1726_p10 = pnand %p1724_p9, %p1721_p8 }
  0x2a   :  { %1729 = shalt.err (!%p1726_p10)
}
  0x2b   :  { %s1730_s23 = scalar_lea.vmem %s2060_s27, 256  ;;  %p1735_p12 = scmp.lt.s32.totalorder %s2060_s27, %s2060_s27 }
  0x2c   :  { %p1731_p11 = scmp.ne.s32.totalorder %s2060_s27, %s1730_s23  ;;  %p1736_p13 = scmp.lt.s32.totalorder %s1730_s23, %s1730_s23 }
  0x2e   :  { %p1737_p0 = por %p1736_p13, %p1735_p12 }
  0x30   :  { %p1738_p1 = pnand %p1737_p0, %p1731_p11 }
  0x32   :  { %1741 = shalt.err (!%p1738_p1)
}
  0x33   :  { %s1934_s25 = smov 64   ;;  %s1935_s29 = smov 4  }
  0x34   :  { %85 = dma.hbm_to_vmem [thread:$0]  %s2444_s6, 256, %s2060_s27, [#allocation9], %s1934_s25, %s1934_s25, %s1935_s29  }
  0x35   :  { %s1936_s3 = smov [#allocation11]   ;;  %s1937_s0 = smov [#allocation14]  }
  0x36   :  { %s106_s28 = sshll.u32 %s1936_s3, 4  ;;  %s129_s4 = sshll.u32 %s1937_s0, 4  ;;  %s107_s28 = int_to_ptr.vmem [resolvable:$true] %s106_s28  ;;  %s2097_s4 = int_to_ptr.vmem [resolvable:$true] %s129_s4 }
  0x37   :  { %s1742_s22 = scalar_lea.hbm %s2447_s9, 16 }
  0x38   :  { %p1743_p2 = scmp.ne.s32.totalorder %s2447_s9, %s1742_s22  ;;  %p1746_p3 = scmp.lt.u32.totalorder %s1742_s22, %s2447_s9 }
  0x3a   :  { %p1748_p4 = pnand %p1746_p3, %p1743_p2 }
  0x3c   :  { %1751 = shalt.err (!%p1748_p4)
}
  0x3d   :  { %s1752_s6 = scalar_lea.vmem %s107_s28, 16  ;;  %s1756_s27 = scalar_lea.vmem %s107_s28, 32 }
  0x3e   :  { %p1753_p5 = scmp.ne.s32.totalorder %s107_s28, %s1752_s6  ;;  %p1757_p6 = scmp.lt.s32.totalorder %s107_s28, %s107_s28 }
  0x3f   :  { %p1758_p7 = scmp.lt.s32.totalorder %s1756_s27, %s1752_s6 }
  0x41   :  { %p1759_p8 = por %p1758_p7, %p1757_p6 }
  0x43   :  { %p1760_p9 = pnand %p1759_p8, %p1753_p5 }
  0x45   :  { %1763 = shalt.err (!%p1760_p9)
}
  0x46   :  { %109 = dma.hbm_to_vmem [thread:$0]  %s2447_s9, 16, %s107_s28, [#allocation12]  }
  0x47   :  { %s1764_s0 = scalar_lea.hbm %s2450_s12, 256 }
  0x48   :  { %p1765_p10 = scmp.ne.s32.totalorder %s2450_s12, %s1764_s0  ;;  %p1768_p11 = scmp.lt.u32.totalorder %s1764_s0, %s2450_s12 }
  0x4a   :  { %p1770_p12 = pnand %p1768_p11, %p1765_p10 }
  0x4c   :  { %1773 = shalt.err (!%p1770_p12)
}
  0x4d   :  { %s1774_s22 = scalar_lea.vmem %s2097_s4, 256  ;;  %p1779_p0 = scmp.lt.s32.totalorder %s2097_s4, %s2097_s4 }
  0x4e   :  { %p1775_p13 = scmp.ne.s32.totalorder %s2097_s4, %s1774_s22  ;;  %p1780_p1 = scmp.lt.s32.totalorder %s1774_s22, %s1774_s22 }
  0x50   :  { %p1781_p2 = por %p1780_p1, %p1779_p0 }
  0x52   :  { %p1782_p3 = pnand %p1781_p2, %p1775_p13 }
  0x54   :  { %1785 = shalt.err (!%p1782_p3)
}
  0x55   :  { %135 = dma.hbm_to_vmem [thread:$0]  %s2450_s12, 256, %s2097_s4, [#allocation15], %s1934_s25, %s1934_s25, %s1935_s29  }
  0x56   :  { %s1938_s23 = smov [#allocation2]   ;;  %s1939_s27 = smov [#allocation7]  }
  0x57   :  { %s43_s6 = sshll.u32 %s1938_s23, 4  ;;  %s67_s2 = sshll.u32 %s1939_s27, 4  ;;  %s44_s6 = int_to_ptr.vmem [resolvable:$true] %s43_s6  ;;  %s2131_s2 = int_to_ptr.vmem [resolvable:$true] %s67_s2 }
  0x58   :  { %s2479_s3 = sld [smem:[#allocation27_spill]] }
  0x5e   :  { %s1786_s0 = scalar_lea.hbm %s2479_s3, 256 }
  0x5f   :  { %p1787_p4 = scmp.ne.s32.totalorder %s2479_s3, %s1786_s0  ;;  %p1790_p5 = scmp.lt.u32.totalorder %s1786_s0, %s2479_s3 }
  0x61   :  { %p1792_p6 = pnand %p1790_p5, %p1787_p4 }
  0x63   :  { %1795 = shalt.err (!%p1792_p6)
}
  0x64   :  { %s1796_s12 = scalar_lea.vmem %s44_s6, 256  ;;  %p1801_p8 = scmp.lt.s32.totalorder %s44_s6, %s44_s6 }
  0x65   :  { %p1797_p7 = scmp.ne.s32.totalorder %s44_s6, %s1796_s12  ;;  %p1802_p9 = scmp.lt.s32.totalorder %s1796_s12, %s1796_s12 }
  0x67   :  { %p1803_p10 = por %p1802_p9, %p1801_p8 }
  0x69   :  { %p1804_p11 = pnand %p1803_p10, %p1797_p7 }
  0x6b   :  { %1807 = shalt.err (!%p1804_p11)
}
  0x6c   :  { %s2480_s4 = smov 8   ;;  %s2481_s22 = smov 128  }
  0x6d   :  { %49 = dma.hbm_to_vmem [thread:$0]  %s2479_s3, 256, %s44_s6, [#allocation3], %s2481_s22, %s2481_s22, %s2480_s4  }
  0x6e   :  { %s2482_s26 = sld [smem:[#allocation29_spill]] }
  0x74   :  { %s1808_s1 = scalar_lea.hbm %s2482_s26, 256 }
  0x75   :  { %p1809_p12 = scmp.ne.s32.totalorder %s2482_s26, %s1808_s1  ;;  %p1812_p13 = scmp.lt.u32.totalorder %s1808_s1, %s2482_s26 }
  0x77   :  { %p1814_p0 = pnand %p1812_p13, %p1809_p12 }
  0x79   :  { %1817 = shalt.err (!%p1814_p0)
}
  0x7a   :  { %s1818_s5 = scalar_lea.vmem %s2131_s2, 256  ;;  %p1823_p2 = scmp.lt.s32.totalorder %s2131_s2, %s2131_s2 }
  0x7b   :  { %p1819_p1 = scmp.ne.s32.totalorder %s2131_s2, %s1818_s5  ;;  %p1824_p3 = scmp.lt.s32.totalorder %s1818_s5, %s1818_s5 }
  0x7d   :  { %p1825_p4 = por %p1824_p3, %p1823_p2 }
  0x7f   :  { %p1826_p5 = pnand %p1825_p4, %p1819_p1 }
  0x81   :  { %1829 = shalt.err (!%p1826_p5)
}
  0x82   :  { %73 = dma.hbm_to_vmem [thread:$0]  %s2482_s26, 256, %s2131_s2, [#allocation6], %s2481_s22, %s2481_s22, %s2480_s4  }
  0x83   :  { %s1940_s12 = smov [#allocation10]   ;;  %s1941_s28 = smov [#allocation13]  }
  0x84   :  { %s91_s9 = sshll.u32 %s1940_s12, 4  ;;  %s117_s23 = sshll.u32 %s1941_s28, 4  ;;  %s92_s9 = int_to_ptr.vmem [resolvable:$true] %s91_s9  ;;  %s2168_s23 = int_to_ptr.vmem [resolvable:$true] %s117_s23 }
  0x85   :  { %s1830_s0 = scalar_lea.hbm %s2445_s7, 256 }
  0x86   :  { %p1831_p6 = scmp.ne.s32.totalorder %s2445_s7, %s1830_s0  ;;  %p1834_p7 = scmp.lt.u32.totalorder %s1830_s0, %s2445_s7 }
  0x88   :  { %p1836_p8 = pnand %p1834_p7, %p1831_p6 }
  0x8a   :  { %1839 = shalt.err (!%p1836_p8)
}
  0x8b   :  { %s1840_s2 = scalar_lea.vmem %s92_s9, 256  ;;  %p1845_p10 = scmp.lt.s32.totalorder %s92_s9, %s92_s9 }
  0x8c   :  { %p1841_p9 = scmp.ne.s32.totalorder %s92_s9, %s1840_s2  ;;  %p1846_p11 = scmp.lt.s32.totalorder %s1840_s2, %s1840_s2 }
  0x8e   :  { %p1847_p12 = por %p1846_p11, %p1845_p10 }
  0x90   :  { %p1848_p13 = pnand %p1847_p12, %p1841_p9 }
  0x92   :  { %1851 = shalt.err (!%p1848_p13)
}
  0x93   :  { %97 = dma.hbm_to_vmem [thread:$0]  %s2445_s7, 256, %s92_s9, [#allocation9], %s1934_s25, %s1934_s25, %s1935_s29  }
  0x94   :  { %s1852_s28 = scalar_lea.hbm %s2449_s11, 256 }
  0x95   :  { %p1853_p0 = scmp.ne.s32.totalorder %s2449_s11, %s1852_s28  ;;  %p1856_p1 = scmp.lt.u32.totalorder %s1852_s28, %s2449_s11 }
  0x97   :  { %p1858_p2 = pnand %p1856_p1, %p1853_p0 }
  0x99   :  { %1861 = shalt.err (!%p1858_p2)
}
  0x9a   :  { %s1862_s24 = scalar_lea.vmem %s2168_s23, 256  ;;  %p1867_p4 = scmp.lt.s32.totalorder %s2168_s23, %s2168_s23 }
  0x9b   :  { %p1863_p3 = scmp.ne.s32.totalorder %s2168_s23, %s1862_s24  ;;  %p1868_p5 = scmp.lt.s32.totalorder %s1862_s24, %s1862_s24 }
  0x9d   :  { %p1869_p6 = por %p1868_p5, %p1867_p4 }
  0x9f   :  { %p1870_p7 = pnand %p1869_p6, %p1863_p3 }
  0xa1   :  { %1873 = shalt.err (!%p1870_p7)
}
  0xa2   :  { %123 = dma.hbm_to_vmem [thread:$0]  %s2449_s11, 256, %s2168_s23, [#allocation12], %s1934_s25, %s1934_s25, %s1935_s29  }
  0xa3   :  { %s1942_s30 = smov [#allocation16]   ;;  %s1874_s6 = scalar_lea.hbm %s2451_s13, 16 }
  0xa4   :  { %s142_s5 = sshll.u32 %s1942_s30, 4  ;;  %p1875_p8 = scmp.ne.s32.totalorder %s2451_s13, %s1874_s6  ;;  %s143_s5 = int_to_ptr.vmem [resolvable:$true] %s142_s5 }
  0xa5   :  { %p1878_p9 = scmp.lt.u32.totalorder %s1874_s6, %s2451_s13 }
  0xa7   :  { %p1880_p10 = pnand %p1878_p9, %p1875_p8 }
  0xa9   :  { %1883 = shalt.err (!%p1880_p10)
}
  0xaa   :  { %s1884_s1 = scalar_lea.vmem %s143_s5, 16  ;;  %s1888_s11 = scalar_lea.vmem %s143_s5, 32 }
  0xab   :  { %p1885_p11 = scmp.ne.s32.totalorder %s143_s5, %s1884_s1  ;;  %p1889_p12 = scmp.lt.s32.totalorder %s143_s5, %s143_s5 }
  0xac   :  { %p1890_p13 = scmp.lt.s32.totalorder %s1888_s11, %s1884_s1 }
  0xae   :  { %p1891_p0 = por %p1890_p13, %p1889_p12 }
  0xb0   :  { %p1892_p1 = pnand %p1891_p0, %p1885_p11 }
  0xb2   :  { %1895 = shalt.err (!%p1892_p1)
}
  0xb3   :  { %145 = dma.hbm_to_vmem [thread:$0]  %s2451_s13, 16, %s143_s5, [#allocation15]  }
  0xb4   :  { %1918 = dma.done.wait [#allocation3], 256  }
  0xb5   :  { %1919 = vsyncadd [#allocation3], 4294967040 }
  0xb6   :  { %1920 = dma.done.wait [#allocation6], 512  }
  0xb7   :  { %1921 = vsyncadd [#allocation6], 4294966784 }
  0xb8   :  { %1922 = dma.done.wait [#allocation9], 512  }
  0xb9   :  { %1923 = vsyncadd [#allocation9], 4294966784 }
  0xba   :  { %1924 = dma.done.wait [#allocation12], 272  }
  0xbb   :  { %1925 = vsyncadd [#allocation12], 4294967024 }
  0xbc   :  { %1926 = dma.done.wait [#allocation15], 272  }
  0xbd   :  { %1927 = vsyncadd [#allocation15], 4294967024  ;;  %v1943_v0 = vmov 0.0   ;;  %vm1944_vm0 = vmmov 0   ;;  %v1638_v1 = vld [vmem:[#allocation8] sm:$0xff]   ;;  %v1639_v2 = vld [vmem:[#allocation8 + $0x8] sm:$0xff]  }
  0xbe   :  { %1502 = vmatprep.subr.bf16.mxu1 %v1943_v0  ;;  %1506 = vmatprep.mubr.msk.bf16.mxu1 %vm1944_vm0, %v1943_v0  ;;  %s2483_s21 = sld [smem:[#allocation24_spill]]  ;;  %s2484_s5 = sld [smem:[#allocation25_spill]]  ;;  %v194_v8 = vld [vmem:[#allocation7] sm:$0xff]  ;;  %v195_v9 = vld [vmem:[#allocation7 + $0x8] sm:$0xff]  ;;  %vm217_vm1 = vcmask 261120   ;;  %vm272_vm2 = vcmask 130048  }
  0xbf   :  { %1516 = vmatprep.subr.bf16.mxu0 %v1943_v0  ;;  %1518 = vmatprep.mubr.msk.bf16.mxu0 %vm1944_vm0, %v1943_v0  ;;  %v196_v11 = vmul.f32 2.0, %v194_v8  ;;  %v197_v12 = vmul.f32 2.0, %v195_v9  ;;  %s1945_s6 = smov 112   ;;  %s1946_s3 = smov 96   ;;  %v262_v27 = vld [vmem:[#allocation2] sm:$0xff]  ;;  %v263_v31 = vld [vmem:[#allocation2 + $0x8] sm:$0xff] }
  0xc0   :  { %1503 = vmatpush3.bf16.msra.mxu1 %v1638_v1  ;;  %s1947_s12 = smov 80   ;;  %s1948_s28 = smov 48   ;;  %vm1306_vm3 = vcmask 523264  }
  0xc1   :  { %1504 = vmatprep.subr.bf16.mxu1 %v1943_v0  ;;  %s2485_s1 = sld [smem:[#allocation26_spill]]  ;;  %s1949_s13 = smov [#allocation17]  }
  0xc2   :  { %s1404_s0 = sshll.u32 %s1949_s13, 4  ;;  %s1405_s0 = int_to_ptr.vmem [resolvable:$true] %s1404_s0 }
  0xc3   :  { %p1901_p3 = scmp.lt.s32.totalorder %s1405_s0, %s1405_s0 }
  0xc4   :  { %v188_v3 = vld [vmem:[%s2483_s21] sm:$0xff]  ;;  %v189_v4 = vld [vmem:[%s2483_s21 + $0x8] sm:$0xff]  ;;  %1505 = vmatpush3.bf16.msra.mxu1 %v1639_v2  ;;  %s1896_s21 = scalar_lea.vmem %s1405_s0, 256 }
  0xc5   :  { %v190_v5 = vld [vmem:[%s2484_s5] sm:$0xff]  ;;  %v191_v6 = vld [vmem:[%s2484_s5 + $0x8] sm:$0xff]  ;;  %1510 = vmatprep.subr.bf16.mxu1 %v1943_v0  ;;  %p1897_p2 = scmp.ne.s32.totalorder %s1405_s0, %s1896_s21  ;;  %p1902_p4 = scmp.lt.s32.totalorder %s1896_s21, %s1896_s21 }
  0xc6   :  { %v192_v7 = vadd.f32 %v190_v5, %v188_v3  ;;  %v193_v10 = vadd.f32 %v191_v6, %v189_v4 }
  0xc7   :  { %p1903_p5 = por %p1902_p4, %p1901_p3 }
  0xc8   :  { %v2236_v13 = vadd.f32 %v196_v11, %v192_v7  ;;  %v2238_v14 = vadd.f32 %v197_v12, %v193_v10 }
  0xc9   :  { %p1904_p6 = pnand %p1903_p5, %p1897_p2 }
  0xca   :  { %v200_v15 = vpack.c.bf16 %v2238_v14, %v2236_v13 }
  0xcc   :  { %1507 = vmatmul.mubr.msk.bf16.vlgmr.msra.gmra.mrb[0].mxu1 %vm217_vm1, %v200_v15 }
  0xcd   :  { %1512 = vmatprep.mubr.msk.bf16.mxu1 %vm1944_vm0, %v1943_v0 }
 0x19f   :  { %v255_v16 = vpop.f32.mrb[0].mxu1 }
 0x1a0   :  { %v1508_v17 = vpop.f32.mrb[1].mxu1 }
 0x1a1   :  { %v258_v18 = vpop.f32.mrb[2].mxu1 }
 0x1a2   :  { %v2246_v19 = vpack.c.bf16 %v258_v18, %v255_v16  ;;  %v1509_v20 = vpop.f32.mrb[3].mxu1 }
 0x1a4   :  { %395 = vrot.lane.b32.xlu1 %v2246_v19, %s1945_s6  ;;  %270 = vrot.lane.b32.xlu0 %v2246_v19, %s1946_s3 }
 0x1a8   :  { %397 = vrot.lane.b32.xlu0 %v2246_v19, %s1947_s12 }
 0x216   :  { %v271_v21 = vpop.permute.xlu0 %270  ;;  %v396_v25 = vpop.permute.xlu1 %395 }
 0x217   :  { %v277_v22 = vsel %vm272_vm2, %v271_v21, 0 }
 0x218   :  { %1511 = vmatpush3.bf16.xpose.msra.mxu1 %v277_v22 }
 0x219   :  { %1522 = vmatprep.subr.bf16.mxu1 %v1943_v0 }
 0x21a   :  { %v398_v23 = vpop.permute.xlu0 %397 }
 0x21b   :  { %v403_v24 = vsel %vm272_vm2, %v398_v23, 0  ;;  %v1640_v23 = vld [vmem:[#allocation10] sm:$0xff]  }
 0x21f   :  { %1513 = vmatmul.mubr.msk.bf16.vlgmr.msra.gmra.mrb[4].mxu1 %vm272_vm2, %v2246_v19 }
 0x220   :  { %1523 = vmatpush3.bf16.xpose.msra.mxu1 %v403_v24  ;;  %1524 = vmatprep.mubr.msk.bf16.mxu1 %vm1944_vm0, %v1943_v0  ;;  %v1641_v24 = vld [vmem:[#allocation10 + $0x8] sm:$0xff]  }
 0x221   :  { %1534 = vmatprep.subr.bf16.mxu1 %v1943_v0 }
 0x227   :  { %1525 = vmatmul.mubr.msk.bf16.vlgmr.msra.gmra.mrb[8].mxu1 %vm272_vm2, %v396_v25 }
 0x228   :  { %1536 = vmatprep.mubr.msk.bf16.mxu1 %vm1944_vm0, %v1943_v0  ;;  %1535 = vmatpush3.bf16.msra.mxu1 %v1641_v24 }
 0x229   :  { %1546 = vmatprep.subr.bf16.mxu1 %v1943_v0 }
 0x2f2   :  { %v313_v26 = vpop.f32.mrb[4].mxu1 }
 0x2f3   :  { %v320_v28 = vmul.f32 0.25, %v313_v26  ;;  %v1514_v29 = vpop.f32.mrb[5].mxu1 }
 0x2f4   :  { %v316_v30 = vpop.f32.mrb[6].mxu1 }
 0x2f5   :  { %v321_v32 = vmul.f32 0.25, %v316_v30  ;;  %v1515_v33 = vpop.f32.mrb[7].mxu1  ;;  %v322_v34 = vadd.f32 %v320_v28, %v262_v27 }
 0x2f7   :  { %v324_v35 = vsel %vm272_vm2, %v322_v34, -inf  ;;  %v323_v36 = vadd.f32 %v321_v32, %v263_v31 }
 0x2f8   :  { %325 = vmax.xlane.f32.xlu1 %v324_v35 }
 0x2f9   :  { %v327_v37 = vsel %vm272_vm2, %v323_v36, -inf }
 0x2fa   :  { %328 = vmax.xlane.f32.xlu0 %v327_v37  ;;  %v439_v38 = vpop.f32.mrb[8].mxu1 }
 0x2fb   :  { %v446_v39 = vmul.f32 0.25, %v439_v38  ;;  %v1526_v40 = vpop.f32.mrb[9].mxu1 }
 0x2fc   :  { %v442_v41 = vpop.f32.mrb[10].mxu1 }
 0x2fd   :  { %v447_v42 = vmul.f32 0.25, %v442_v41  ;;  %v1527_v43 = vpop.f32.mrb[11].mxu1  ;;  %v448_v44 = vadd.f32 %v446_v39, %v262_v27 }
 0x2ff   :  { %v450_v45 = vsel %vm272_vm2, %v448_v44, -inf  ;;  %v449_v46 = vadd.f32 %v447_v42, %v263_v31 }
 0x300   :  { %451 = vmax.xlane.f32.xlu0 %v450_v45 }
 0x301   :  { %v453_v47 = vsel %vm272_vm2, %v449_v46, -inf }
 0x302   :  { %454 = vmax.xlane.f32.xlu1 %v453_v47 }
 0x385   :  { %v326_v48 = vpop.xlane.xlu1 %325 }
 0x386   :  { %v330_v49 = vsub.f32 %v322_v34, %v326_v48 }
 0x387   :  { %v329_v50 = vpop.xlane.xlu0 %328 }
 0x388   :  { %v332_v51 = vmul.f32 1.442695, %v330_v49  ;;  %v331_v52 = vsub.f32 %v323_v36, %v329_v50 }
 0x38a   :  { %1654 = vpow2.f32 %v332_v51  ;;  %v334_v53 = vmul.f32 1.442695, %v331_v52 }
 0x38c   :  { %1656 = vpow2.f32 %v334_v53 }
 0x38d   :  { %v452_v54 = vpop.xlane.xlu0 %451 }
 0x38e   :  { %v456_v55 = vsub.f32 %v448_v44, %v452_v54 }
 0x38f   :  { %v455_v56 = vpop.xlane.xlu1 %454 }
 0x390   :  { %v458_v57 = vmul.f32 1.442695, %v456_v55  ;;  %v457_v58 = vsub.f32 %v449_v46, %v455_v56 }
 0x392   :  { %1658 = vpow2.f32 %v458_v57  ;;  %v460_v59 = vmul.f32 1.442695, %v457_v58  ;;  %v1642_v58 = vld [vmem:[#allocation13] sm:$0xff]  }
 0x394   :  { %v1655_v60 = vpop.eup %1654  ;;  %1660 = vpow2.f32 %v460_v59  ;;  %v729_v59 = vld [vmem:[%s2485_s1] sm:$0xff] }
 0x395   :  { %v336_v61 = vsel %vm272_vm2, %v1655_v60, 0.0 }
 0x396   :  { %v1657_v62 = vpop.eup %1656  ;;  %337 = vadd.xlane.f32.xlu0 %v336_v61 }
 0x397   :  { %v339_v63 = vsel %vm272_vm2, %v1657_v62, 0.0 }
 0x398   :  { %340 = vadd.xlane.f32.xlu1 %v339_v63  ;;  %v1645_v63 = vld [vmem:[%s2448_s10 + $0x8] sm:$0xff]  }
 0x39c   :  { %v1659_v1 = vpop.eup %1658 }
 0x39d   :  { %v462_v2 = vsel %vm272_vm2, %v1659_v1, 0.0 }
 0x39e   :  { %v1661_v3 = vpop.eup %1660  ;;  %463 = vadd.xlane.f32.xlu0 %v462_v2 }
 0x39f   :  { %v465_v4 = vsel %vm272_vm2, %v1661_v3, 0.0 }
 0x3a0   :  { %466 = vadd.xlane.f32.xlu1 %v465_v4 }
 0x3b1   :  { %473 = vrot.lane.b32.xlu1 %v2246_v19, %s1948_s28 }
 0x3b4   :  { %347 = vrot.lane.b32.xlu0 %v2246_v19, %s1934_s25 }
 0x423   :  { %v338_v5 = vpop.xlane.xlu0 %337 }
 0x424   :  { %1662 = vrcp.f32 %v338_v5 }
 0x425   :  { %v341_v6 = vpop.xlane.xlu1 %340 }
 0x426   :  { %1664 = vrcp.f32 %v341_v6 }
 0x42b   :  { %v464_v7 = vpop.xlane.xlu0 %463 }
 0x42c   :  { %1666 = vrcp.f32 %v464_v7 }
 0x42d   :  { %v467_v8 = vpop.xlane.xlu1 %466 }
 0x42e   :  { %v1663_v9 = vpop.eup %1662  ;;  %1668 = vrcp.f32 %v467_v8  ;;  %v1431_v8 = vld [vmem:[%s2446_s8] ss:$0 sm:$0xff] }
 0x42f   :  { %v348_v10 = vpop.permute.xlu0 %347  ;;  %v344_v12 = vmul.f32 %v1663_v9, %v1655_v60  ;;  %v730_v60 = vld [vmem:[%s2485_s1 + $0x8] sm:$0xff] }
 0x430   :  { %v1665_v11 = vpop.eup %1664  ;;  %1517 = vmatpush3.bf16.msra.mxu0 %v348_v10  ;;  %v731_v61 = vpack.c.bf16 %v730_v60, %v729_v59 }
 0x431   :  { %1528 = vmatprep.subr.bf16.mxu0 %v1943_v0  ;;  %v345_v15 = vmul.f32 %v1665_v11, %v1657_v62  ;;  %v474_v17 = vpop.permute.xlu1 %473  ;;  %v1644_v62 = vld [vmem:[%s2448_s10] sm:$0xff]  }
 0x433   :  { %v346_v16 = vpack.c.bf16 %v345_v15, %v344_v12  ;;  %v1432_v15 = vld [vmem:[#allocation11] ss:$0 sm:$0xff] }
 0x435   :  { %1519 = vmatmul.mubr.msk.bf16.vlgmr.msra.gmra.mrb[0].mxu0 %vm272_vm2, %v346_v16 }
 0x436   :  { %v1667_v18 = vpop.eup %1666  ;;  %1529 = vmatpush3.bf16.msra.mxu0 %v474_v17  ;;  %1530 = vmatprep.mubr.msk.bf16.mxu0 %vm1944_vm0, %v1943_v0 }
 0x437   :  { %1540 = vmatprep.subr.bf16.mxu0 %v1943_v0  ;;  %v470_v20 = vmul.f32 %v1667_v18, %v1659_v1 }
 0x438   :  { %v1669_v19 = vpop.eup %1668 }
 0x439   :  { %v471_v21 = vmul.f32 %v1669_v19, %v1661_v3 }
 0x43b   :  { %v472_v22 = vpack.c.bf16 %v471_v21, %v470_v20 }
 0x43d   :  { %1531 = vmatmul.mubr.msk.bf16.vlgmr.msra.gmra.mrb[4].mxu0 %vm272_vm2, %v472_v22 }
 0x43e   :  { %1542 = vmatprep.mubr.msk.bf16.mxu0 %vm1944_vm0, %v1943_v0  ;;  %1541 = vmatpush3.bf16.msra.mxu0 %v1640_v23 }
 0x43f   :  { %1554 = vmatprep.subr.bf16.mxu0 %v1943_v0 }
 0x508   :  { %v387_v25 = vpop.f32.mrb[0].mxu0 }
 0x509   :  { %v1520_v26 = vpop.f32.mrb[1].mxu0 }
 0x50a   :  { %v390_v27 = vpop.f32.mrb[2].mxu0 }
 0x50b   :  { %v394_v28 = vpack.c.bf16 %v390_v27, %v387_v25  ;;  %v1521_v29 = vpop.f32.mrb[3].mxu0 }
 0x50d   :  { %1543 = vmatmul.mubr.msk.bf16.vlgmr.msra.gmra.mrb[8].mxu0 %vm272_vm2, %v394_v28 }
 0x50e   :  { %1558 = vmatprep.mubr.msk.bf16.mxu0 %vm1944_vm0, %v1943_v0  ;;  %1555 = vmatpush3.bf16.msra.mxu0 %v1642_v58 }
 0x50f   :  { %1556 = vmatprep.subr.bf16.mxu0 %v1943_v0 }
 0x510   :  { %v513_v30 = vpop.f32.mrb[4].mxu0 }
 0x511   :  { %v1532_v31 = vpop.f32.mrb[5].mxu0 }
 0x512   :  { %v516_v32 = vpop.f32.mrb[6].mxu0 }
 0x513   :  { %v520_v33 = vpack.c.bf16 %v516_v32, %v513_v30  ;;  %v1533_v34 = vpop.f32.mrb[7].mxu0 }
 0x515   :  { %1537 = vmatmul.mubr.msk.bf16.vlgmr.msra.gmra.mrb[12].mxu1 %vm272_vm2, %v520_v33 }
 0x516   :  { %1550 = vmatprep.mubr.msk.bf16.mxu1 %vm1944_vm0, %v1943_v0  ;;  %1547 = vmatpush3.bf16.msra.mxu1 %v1644_v62 }
 0x517   :  { %1548 = vmatprep.subr.bf16.mxu1 %v1943_v0 }
 0x51a   :  { %1549 = vmatpush3.bf16.msra.mxu1 %v1645_v63 }
 0x51b   :  { %1562 = vmatprep.subr.bf16.mxu1 %v1943_v0 }
 0x5e0   :  { %v614_v35 = vpop.f32.mrb[8].mxu0 }
 0x5e1   :  { %v1544_v36 = vpop.f32.mrb[9].mxu0 }
 0x5e2   :  { %v617_v37 = vpop.f32.mrb[10].mxu0 }
 0x5e3   :  { %v1545_v38 = vpop.f32.mrb[11].mxu0 }
 0x5e8   :  { %v564_v39 = vpop.f32.mrb[12].mxu1 }
 0x5e9   :  { %v615_v40 = vadd.f32 %v614_v35, %v564_v39  ;;  %v1538_v41 = vpop.f32.mrb[13].mxu1  ;;  %v792_v35 = vld [vmem:[#allocation5] sm:$0xff]  ;;  %v793_v39 = vld [vmem:[#allocation5 + $0x8] sm:$0xff] }
 0x5ea   :  { %v567_v42 = vpop.f32.mrb[14].mxu1 }
 0x5eb   :  { %v618_v43 = vadd.f32 %v617_v37, %v567_v42  ;;  %v1539_v44 = vpop.f32.mrb[15].mxu1  ;;  %v621_v45 = vadd.f32 %v615_v40, %v2236_v13 }
 0x5ed   :  { %v625_v46 = vsel %vm217_vm1, %v621_v45, 0.0  ;;  %v622_v47 = vadd.f32 %v618_v43, %v2238_v14  ;;  %v1643_v14 = vld [vmem:[#allocation13 + $0x8] sm:$0xff]  }
 0x5ee   :  { %626 = vadd.xlane.f32.xlu1 %v625_v46  ;;  %1557 = vmatpush3.bf16.msra.mxu0 %v1643_v14 }
 0x5ef   :  { %v628_v48 = vsel %vm217_vm1, %v622_v47, 0.0  ;;  %1568 = vmatprep.subr.bf16.mxu0 %v1943_v0 }
 0x5f0   :  { %629 = vadd.xlane.f32.xlu0 %v628_v48 }
 0x5f1   :  { %1559 = vmatmul.mubr.msk.bf16.vlgmr.msra.gmra.mrb[12].mxu0 %vm217_vm1, %v731_v61 }
 0x5f2   :  { %1570 = vmatprep.mubr.msk.bf16.mxu0 %vm1944_vm0, %v1943_v0 }
 0x67b   :  { %v627_v49 = vpop.xlane.xlu1 %626 }
 0x67c   :  { %v632_v50 = vmul.f32 0.03125, %v627_v49 }
 0x67d   :  { %v630_v51 = vpop.xlane.xlu0 %629 }
 0x67e   :  { %v634_v52 = vsub.f32 %v621_v45, %v632_v50  ;;  %v633_v53 = vmul.f32 0.03125, %v630_v51 }
 0x680   :  { %v635_v54 = vsub.f32 %v622_v47, %v633_v53  ;;  %v636_v55 = vmul.f32 %v634_v52, %v634_v52 }
 0x682   :  { %v638_v56 = vsel %vm217_vm1, %v636_v55, 0.0  ;;  %v637_v57 = vmul.f32 %v635_v54, %v635_v54 }
 0x683   :  { %639 = vadd.xlane.f32.xlu0 %v638_v56 }
 0x684   :  { %v641_v13 = vsel %vm217_vm1, %v637_v57, 0.0 }
 0x685   :  { %642 = vadd.xlane.f32.xlu1 %v641_v13 }
 0x6c4   :  { %v785_v20 = vpop.f32.mrb[12].mxu0 }
 0x6c5   :  { %v1560_v21 = vpop.f32.mrb[13].mxu0 }
 0x6c6   :  { %v788_v22 = vpop.f32.mrb[14].mxu0 }
 0x6c7   :  { %v2329_v23 = vpack.c.bf16 %v788_v22, %v785_v20  ;;  %v1561_v24 = vpop.f32.mrb[15].mxu0 }
 0x6c9   :  { %926 = vrot.lane.b32.xlu0 %v2329_v23, %s1945_s6  ;;  %v804_v25 = vsel %vm272_vm2, %v2329_v23, 0 }
 0x710   :  { %v640_v1 = vpop.xlane.xlu0 %639 }
 0x711   :  { %v644_v2 = vmul.f32 0.03125, %v640_v1 }
 0x712   :  { %v643_v3 = vpop.xlane.xlu1 %642 }
 0x713   :  { %v646_v4 = vadd.f32 1e-06, %v644_v2  ;;  %v645_v5 = vmul.f32 0.03125, %v643_v3 }
 0x715   :  { %1670 = vrsqrt.f32 %v646_v4  ;;  %v647_v6 = vadd.f32 1e-06, %v645_v5 }
 0x717   :  { %1672 = vrsqrt.f32 %v647_v6 }
 0x71f   :  { %v1671_v7 = vpop.eup %1670 }
 0x720   :  { %v650_v9 = vmul.f32 %v1671_v7, %v634_v52 }
 0x721   :  { %v1673_v10 = vpop.eup %1672 }
 0x722   :  { %v658_v11 = vmul.f32 %v1431_v8, %v650_v9  ;;  %v651_v12 = vmul.f32 %v1673_v10, %v635_v54 }
 0x724   :  { %v659_v16 = vmul.f32 %v1431_v8, %v651_v12  ;;  %v2320_v17 = vadd.f32 %v1432_v15, %v658_v11 }
 0x726   :  { %v2322_v18 = vadd.f32 %v1432_v15, %v659_v16 }
 0x728   :  { %v668_v19 = vpack.c.bf16 %v2322_v18, %v2320_v17 }
 0x72a   :  { %1551 = vmatmul.mubr.msk.bf16.vlgmr.msra.gmra.mrb[16].mxu1 %vm217_vm1, %v668_v19 }
 0x72b   :  { %1564 = vmatprep.mubr.msk.bf16.mxu1 %vm1944_vm0, %v1943_v0  ;;  %1563 = vmatpush3.bf16.xpose.msra.mxu1 %v804_v25 }
 0x72c   :  { %1574 = vmatprep.subr.bf16.mxu1 %v1943_v0 }
 0x73b   :  { %v927_v27 = vpop.permute.xlu0 %926 }
 0x73c   :  { %v932_v32 = vsel %vm272_vm2, %v927_v27, 0 }
 0x7fd   :  { %v722_v26 = vpop.f32.mrb[16].mxu1 }
 0x7fe   :  { %v1552_v28 = vpop.f32.mrb[17].mxu1 }
 0x7ff   :  { %v725_v29 = vpop.f32.mrb[18].mxu1 }
 0x800   :  { %v798_v30 = vpack.c.bf16 %v725_v29, %v722_v26  ;;  %v1553_v31 = vpop.f32.mrb[19].mxu1 }
 0x801   :  { %v1646_v31 = vld [vmem:[#allocation14] sm:$0xff]  }
 0x802   :  { %924 = vrot.lane.b32.xlu1 %v798_v30, %s1945_s6  ;;  %1565 = vmatmul.mubr.msk.bf16.vlgmr.msra.gmra.mrb[20].mxu1 %vm272_vm2, %v798_v30 }
 0x803   :  { %1575 = vmatpush3.bf16.xpose.msra.mxu1 %v932_v32  ;;  %1576 = vmatprep.mubr.msk.bf16.mxu1 %vm1944_vm0, %v1943_v0  ;;  %v1647_v32 = vld [vmem:[#allocation14 + $0x8] sm:$0xff]  }
 0x804   :  { %1586 = vmatprep.subr.bf16.mxu1 %v1943_v0 }
 0x874   :  { %v925_v33 = vpop.permute.xlu1 %924 }
 0x875   :  { %1577 = vmatmul.mubr.msk.bf16.vlgmr.msra.gmra.mrb[24].mxu1 %vm272_vm2, %v925_v33 }
 0x876   :  { %1588 = vmatprep.mubr.msk.bf16.mxu1 %vm1944_vm0, %v1943_v0  ;;  %1587 = vmatpush3.bf16.msra.mxu1 %v1647_v32 }
 0x877   :  { %1598 = vmatprep.subr.bf16.mxu1 %v1943_v0 }
 0x8d5   :  { %v840_v34 = vpop.f32.mrb[20].mxu1 }
 0x8d6   :  { %v847_v36 = vmul.f32 0.25, %v840_v34  ;;  %v1566_v37 = vpop.f32.mrb[21].mxu1 }
 0x8d7   :  { %v843_v38 = vpop.f32.mrb[22].mxu1 }
 0x8d8   :  { %v848_v40 = vmul.f32 0.25, %v843_v38  ;;  %v1567_v41 = vpop.f32.mrb[23].mxu1  ;;  %v849_v42 = vadd.f32 %v847_v36, %v792_v35 }
 0x8da   :  { %v851_v43 = vsel %vm272_vm2, %v849_v42, -inf  ;;  %v850_v44 = vadd.f32 %v848_v40, %v793_v39 }
 0x8db   :  { %852 = vmax.xlane.f32.xlu1 %v851_v43 }
 0x8dc   :  { %v854_v45 = vsel %vm272_vm2, %v850_v44, -inf }
 0x8dd   :  { %855 = vmax.xlane.f32.xlu0 %v854_v45 }
 0x948   :  { %v968_v46 = vpop.f32.mrb[24].mxu1 }
 0x949   :  { %v975_v47 = vmul.f32 0.25, %v968_v46  ;;  %v1578_v48 = vpop.f32.mrb[25].mxu1 }
 0x94a   :  { %v971_v49 = vpop.f32.mrb[26].mxu1 }
 0x94b   :  { %v976_v50 = vmul.f32 0.25, %v971_v49  ;;  %v1579_v51 = vpop.f32.mrb[27].mxu1  ;;  %v977_v52 = vadd.f32 %v975_v47, %v792_v35 }
 0x94d   :  { %v979_v53 = vsel %vm272_vm2, %v977_v52, -inf  ;;  %v978_v54 = vadd.f32 %v976_v50, %v793_v39 }
 0x94e   :  { %980 = vmax.xlane.f32.xlu0 %v979_v53 }
 0x94f   :  { %v982_v55 = vsel %vm272_vm2, %v978_v54, -inf }
 0x950   :  { %983 = vmax.xlane.f32.xlu1 %v982_v55 }
 0x968   :  { %v853_v56 = vpop.xlane.xlu1 %852 }
 0x969   :  { %v857_v57 = vsub.f32 %v849_v42, %v853_v56 }
 0x96a   :  { %v856_v13 = vpop.xlane.xlu0 %855 }
 0x96b   :  { %v859_v58 = vmul.f32 1.442695, %v857_v57  ;;  %v858_v14 = vsub.f32 %v850_v44, %v856_v13 }
 0x96d   :  { %1674 = vpow2.f32 %v859_v58  ;;  %v861_v59 = vmul.f32 1.442695, %v858_v14 }
 0x96f   :  { %1676 = vpow2.f32 %v861_v59 }
 0x977   :  { %v1675_v60 = vpop.eup %1674 }
 0x978   :  { %v863_v61 = vsel %vm272_vm2, %v1675_v60, 0.0 }
 0x979   :  { %v1677_v62 = vpop.eup %1676  ;;  %864 = vadd.xlane.f32.xlu0 %v863_v61 }
 0x97a   :  { %v866_v63 = vsel %vm272_vm2, %v1677_v62, 0.0 }
 0x97b   :  { %867 = vadd.xlane.f32.xlu1 %v866_v63 }
 0x9db   :  { %v981_v1 = vpop.xlane.xlu0 %980 }
 0x9dc   :  { %v985_v2 = vsub.f32 %v977_v52, %v981_v1  ;;  %v1649_v1 = vld [vmem:[%s2453_s15 + $0x8] sm:$0xff]  }
 0x9dd   :  { %v984_v3 = vpop.xlane.xlu1 %983 }
 0x9de   :  { %v987_v4 = vmul.f32 1.442695, %v985_v2  ;;  %v986_v5 = vsub.f32 %v978_v54, %v984_v3  ;;  %v1650_v2 = vld [vmem:[%s2455_s17] sm:$0xff]   ;;  %v1651_v3 = vld [vmem:[%s2455_s17 + $0x8] sm:$0xff]  }
 0x9e0   :  { %1678 = vpow2.f32 %v987_v4  ;;  %v989_v6 = vmul.f32 1.442695, %v986_v5 }
 0x9e2   :  { %1680 = vpow2.f32 %v989_v6 }
 0x9ea   :  { %v1679_v7 = vpop.eup %1678 }
 0x9eb   :  { %v991_v8 = vsel %vm272_vm2, %v1679_v7, 0.0 }
 0x9ec   :  { %v1681_v9 = vpop.eup %1680  ;;  %992 = vadd.xlane.f32.xlu0 %v991_v8 }
 0x9ed   :  { %v994_v10 = vsel %vm272_vm2, %v1681_v9, 0.0 }
 0x9ee   :  { %995 = vadd.xlane.f32.xlu1 %v994_v10 }
 0x9ff   :  { %1002 = vrot.lane.b32.xlu1 %v2329_v23, %s1947_s12 }
 0xa02   :  { %875 = vrot.lane.b32.xlu0 %v2329_v23, %s1946_s3 }
 0xa06   :  { %v865_v12 = vpop.xlane.xlu0 %864 }
 0xa08   :  { %v868_v11 = vpop.xlane.xlu1 %867 }
 0xa09   :  { %1682 = vrcp.f32 %v868_v11  ;;  %v1447_v11 = vld [vmem:[#allocation16] ss:$0 sm:$0xff] }
 0xa0a   :  { %1684 = vrcp.f32 %v865_v12 }
 0xa13   :  { %v1683_v15 = vpop.eup %1682 }
 0xa14   :  { %v1685_v19 = vpop.eup %1684  ;;  %v872_v20 = vmul.f32 %v1683_v15, %v1677_v62 }
 0xa15   :  { %v871_v22 = vmul.f32 %v1685_v19, %v1675_v60 }
 0xa17   :  { %v873_v25 = vpack.c.bf16 %v872_v20, %v871_v22  ;;  %v1448_v20 = vld [vmem:[%s2452_s14] ss:$0 sm:$0xff] }
 0xa79   :  { %v993_v16 = vpop.xlane.xlu0 %992 }
 0xa7a   :  { %1686 = vrcp.f32 %v993_v16 }
 0xa7b   :  { %v996_v21 = vpop.xlane.xlu1 %995 }
 0xa7c   :  { %1688 = vrcp.f32 %v996_v21 }
 0xa7d   :  { %v876_v24 = vpop.permute.xlu0 %875 }
 0xa7e   :  { %1569 = vmatpush3.bf16.msra.mxu0 %v876_v24 }
 0xa7f   :  { %1580 = vmatprep.subr.bf16.mxu0 %v1943_v0  ;;  %v1003_v26 = vpop.permute.xlu1 %1002 }
 0xa81   :  { %1571 = vmatmul.mubr.msk.bf16.vlgmr.msra.gmra.mrb[16].mxu0 %vm272_vm2, %v873_v25 }
 0xa82   :  { %1581 = vmatpush3.bf16.msra.mxu0 %v1003_v26  ;;  %1582 = vmatprep.mubr.msk.bf16.mxu0 %vm1944_vm0, %v1943_v0  ;;  %v1652_v26 = vld [vmem:[%s2455_s17 + $0x10] sm:$0xff]  }
 0xa83   :  { %1592 = vmatprep.subr.bf16.mxu0 %v1943_v0 }
 0xa84   :  { %v1687_v23 = vpop.eup %1686 }
 0xa85   :  { %v999_v28 = vmul.f32 %v1687_v23, %v1679_v7  ;;  %v1653_v23 = vld [vmem:[%s2455_s17 + $0x18] sm:$0xff]  }
 0xa86   :  { %v1689_v27 = vpop.eup %1688 }
 0xa87   :  { %v1000_v29 = vmul.f32 %v1689_v27, %v1681_v9  ;;  %v1449_v27 = vld [vmem:[%s2454_s16] ss:$0 sm:$0xff] }
 0xa89   :  { %v1001_v30 = vpack.c.bf16 %v1000_v29, %v999_v28 }
 0xa8b   :  { %1583 = vmatmul.mubr.msk.bf16.vlgmr.msra.gmra.mrb[20].mxu0 %vm272_vm2, %v1001_v30 }
 0xa8c   :  { %1594 = vmatprep.mubr.msk.bf16.mxu0 %vm1944_vm0, %v1943_v0  ;;  %1593 = vmatpush3.bf16.msra.mxu0 %v1646_v31 }
 0xa8d   :  { %1606 = vmatprep.subr.bf16.mxu0 %v1943_v0 }
 0xb54   :  { %v915_v33 = vpop.f32.mrb[16].mxu0 }
 0xb55   :  { %v1572_v34 = vpop.f32.mrb[17].mxu0 }
 0xb56   :  { %v918_v35 = vpop.f32.mrb[18].mxu0 }
 0xb57   :  { %v922_v36 = vpack.c.bf16 %v918_v35, %v915_v33  ;;  %v1573_v37 = vpop.f32.mrb[19].mxu0 }
 0xb59   :  { %1595 = vmatmul.mubr.msk.bf16.vlgmr.msra.gmra.mrb[24].mxu0 %vm272_vm2, %v922_v36 }
 0xb5a   :  { %1614 = vmatprep.mubr.msk.bf16.mxu0 %vm1944_vm0, %v1943_v0  ;;  %1607 = vmatpush3.bf16.msra.mxu0 %v1650_v2 }
 0xb5b   :  { %1608 = vmatprep.subr.bf16.mxu0 %v1943_v0 }
 0xb5e   :  { %v1042_v38 = vpop.f32.mrb[20].mxu0  ;;  %1609 = vmatpush3.bf16.msra.mxu0 %v1651_v3 }
 0xb5f   :  { %v1584_v39 = vpop.f32.mrb[21].mxu0  ;;  %1610 = vmatprep.subr.bf16.mxu0 %v1943_v0 }
 0xb60   :  { %v1045_v40 = vpop.f32.mrb[22].mxu0 }
 0xb61   :  { %v1049_v41 = vpack.c.bf16 %v1045_v40, %v1042_v38  ;;  %v1585_v42 = vpop.f32.mrb[23].mxu0 }
 0xb62   :  { %1611 = vmatpush3.bf16.msra.mxu0 %v1652_v26 }
 0xb63   :  { %1589 = vmatmul.mubr.msk.bf16.vlgmr.msra.gmra.mrb[28].mxu1 %vm272_vm2, %v1049_v41  ;;  %1612 = vmatprep.subr.bf16.mxu0 %v1943_v0 }
 0xb64   :  { %1602 = vmatprep.mubr.msk.bf16.mxu1 %vm1944_vm0, %v1943_v0 }
 0xb66   :  { %1613 = vmatpush3.bf16.msra.mxu0 %v1653_v23 }
 0xc2c   :  { %v1143_v43 = vpop.f32.mrb[24].mxu0 }
 0xc2d   :  { %v1596_v44 = vpop.f32.mrb[25].mxu0 }
 0xc2e   :  { %v1146_v45 = vpop.f32.mrb[26].mxu0 }
 0xc2f   :  { %v1597_v46 = vpop.f32.mrb[27].mxu0 }
 0xc36   :  { %v1093_v47 = vpop.f32.mrb[28].mxu1 }
 0xc37   :  { %v1144_v48 = vadd.f32 %v1143_v43, %v1093_v47  ;;  %v1590_v49 = vpop.f32.mrb[29].mxu1 }
 0xc38   :  { %v1096_v50 = vpop.f32.mrb[30].mxu1 }
 0xc39   :  { %v1147_v51 = vadd.f32 %v1146_v45, %v1096_v50  ;;  %v1591_v52 = vpop.f32.mrb[31].mxu1  ;;  %v1150_v53 = vadd.f32 %v1144_v48, %v2320_v17 }
 0xc3b   :  { %v1154_v54 = vsel %vm217_vm1, %v1150_v53, 0.0  ;;  %v1151_v55 = vadd.f32 %v1147_v51, %v2322_v18  ;;  %v1648_v18 = vld [vmem:[%s2453_s15] sm:$0xff]  }
 0xc3c   :  { %1155 = vadd.xlane.f32.xlu1 %v1154_v54  ;;  %1599 = vmatpush3.bf16.msra.mxu1 %v1648_v18  ;;  %v1460_v18 = vld [vmem:[%s2458_s20] ss:$0 sm:$0xff] }
 0xc3d   :  { %v1157_v56 = vsel %vm217_vm1, %v1151_v55, 0.0  ;;  %1600 = vmatprep.subr.bf16.mxu1 %v1943_v0  ;;  %v1453_v0 = vld [vmem:[%s2456_s18] ss:$0 sm:$0xff] }
 0xc3e   :  { %1158 = vadd.xlane.f32.xlu0 %v1157_v56 }
 0xc40   :  { %1601 = vmatpush3.bf16.msra.mxu1 %v1649_v1 }
 0xcc9   :  { %v1156_v57 = vpop.xlane.xlu1 %1155 }
 0xcca   :  { %v1160_v13 = vmul.f32 0.03125, %v1156_v57 }
 0xccb   :  { %v1159_v58 = vpop.xlane.xlu0 %1158 }
 0xccc   :  { %v1162_v14 = vsub.f32 %v1150_v53, %v1160_v13  ;;  %v1161_v59 = vmul.f32 0.03125, %v1159_v58 }
 0xcce   :  { %v1163_v60 = vsub.f32 %v1151_v55, %v1161_v59  ;;  %v1164_v61 = vmul.f32 %v1162_v14, %v1162_v14 }
 0xcd0   :  { %v1166_v62 = vsel %vm217_vm1, %v1164_v61, 0.0  ;;  %v1165_v63 = vmul.f32 %v1163_v60, %v1163_v60 }
 0xcd1   :  { %1167 = vadd.xlane.f32.xlu0 %v1166_v62  ;;  %v1459_v62 = vld [vmem:[%s2457_s19] ss:$0 sm:$0xff] }
 0xcd2   :  { %v1169_v17 = vsel %vm217_vm1, %v1165_v63, 0.0 }
 0xcd3   :  { %1170 = vadd.xlane.f32.xlu1 %v1169_v17 }
 0xd5e   :  { %v1168_v4 = vpop.xlane.xlu0 %1167 }
 0xd5f   :  { %v1172_v5 = vmul.f32 0.03125, %v1168_v4 }
 0xd60   :  { %v1171_v6 = vpop.xlane.xlu1 %1170 }
 0xd61   :  { %v1174_v7 = vadd.f32 1e-06, %v1172_v5  ;;  %v1173_v8 = vmul.f32 0.03125, %v1171_v6 }
 0xd63   :  { %1690 = vrsqrt.f32 %v1174_v7  ;;  %v1175_v9 = vadd.f32 1e-06, %v1173_v8 }
 0xd65   :  { %1692 = vrsqrt.f32 %v1175_v9 }
 0xd6d   :  { %v1691_v10 = vpop.eup %1690 }
 0xd6e   :  { %v1178_v12 = vmul.f32 %v1691_v10, %v1162_v14 }
 0xd6f   :  { %v1693_v15 = vpop.eup %1692 }
 0xd70   :  { %v1186_v16 = vmul.f32 %v1447_v11, %v1178_v12  ;;  %v1179_v19 = vmul.f32 %v1693_v15, %v1163_v60 }
 0xd72   :  { %v1187_v21 = vmul.f32 %v1447_v11, %v1179_v19  ;;  %v1194_v22 = vadd.f32 %v1448_v20, %v1186_v16 }
 0xd74   :  { %v1195_v24 = vadd.f32 %v1448_v20, %v1187_v21 }
 0xd76   :  { %v1196_v25 = vpack.c.bf16 %v1195_v24, %v1194_v22 }
 0xd78   :  { %1603 = vmatmul.mubr.msk.bf16.vlgmr.msra.gmra.mrb[32].mxu1 %vm217_vm1, %v1196_v25 }
 0xe4b   :  { %v1257_v28 = vpop.f32.mrb[32].mxu1 }
 0xe4c   :  { %v1258_v29 = vadd.f32 %v1449_v27, %v1257_v28  ;;  %v1604_v30 = vpop.f32.mrb[33].mxu1 }
 0xe4d   :  { %v1260_v31 = vpop.f32.mrb[34].mxu1 }
 0xe4e   :  { %v1261_v32 = vadd.f32 %v1449_v27, %v1260_v31  ;;  %v1605_v33 = vpop.f32.mrb[35].mxu1  ;;  %v1264_v34 = vmax.f32 %v1258_v29, 0.0 }
 0xe50   :  { %v1265_v35 = vmax.f32 %v1261_v32, 0.0 }
 0xe52   :  { %v1266_v36 = vpack.c.bf16 %v1265_v35, %v1264_v34 }
 0xe54   :  { %1615 = vmatmul.mubr.msk.bf16.vlgmr.msra.gmra.mrb[28].mxu0 %vm1306_vm3, %v1266_v36 }
 0xf27   :  { %v1344_v37 = vpop.f32.mrb[28].mxu0 }
 0xf28   :  { %v1345_v38 = vadd.f32 %v1453_v0, %v1344_v37  ;;  %v1616_v39 = vpop.f32.mrb[29].mxu0 }
 0xf29   :  { %v1347_v40 = vpop.f32.mrb[30].mxu0 }
 0xf2a   :  { %v1348_v41 = vadd.f32 %v1453_v0, %v1347_v40  ;;  %v1617_v42 = vpop.f32.mrb[31].mxu0  ;;  %v1351_v43 = vadd.f32 %v1345_v38, %v1194_v22 }
 0xf2c   :  { %v1355_v44 = vsel %vm217_vm1, %v1351_v43, 0.0  ;;  %v1352_v45 = vadd.f32 %v1348_v41, %v1195_v24 }
 0xf2d   :  { %1356 = vadd.xlane.f32.xlu0 %v1355_v44 }
 0xf2e   :  { %v1358_v46 = vsel %vm217_vm1, %v1352_v45, 0.0 }
 0xf2f   :  { %1359 = vadd.xlane.f32.xlu1 %v1358_v46 }
 0xfba   :  { %v1357_v47 = vpop.xlane.xlu0 %1356 }
 0xfbb   :  { %v1361_v48 = vmul.f32 0.03125, %v1357_v47 }
 0xfbc   :  { %v1360_v49 = vpop.xlane.xlu1 %1359 }
 0xfbd   :  { %v1363_v50 = vsub.f32 %v1351_v43, %v1361_v48  ;;  %v1362_v51 = vmul.f32 0.03125, %v1360_v49 }
 0xfbf   :  { %v1364_v52 = vsub.f32 %v1352_v45, %v1362_v51  ;;  %v1365_v53 = vmul.f32 %v1363_v50, %v1363_v50 }
 0xfc1   :  { %v1367_v54 = vsel %vm217_vm1, %v1365_v53, 0.0  ;;  %v1366_v55 = vmul.f32 %v1364_v52, %v1364_v52 }
 0xfc2   :  { %1368 = vadd.xlane.f32.xlu0 %v1367_v54 }
 0xfc3   :  { %v1370_v56 = vsel %vm217_vm1, %v1366_v55, 0.0 }
 0xfc4   :  { %1371 = vadd.xlane.f32.xlu1 %v1370_v56 }
0x104f   :  { %v1369_v57 = vpop.xlane.xlu0 %1368 }
0x1050   :  { %v1373_v13 = vmul.f32 0.03125, %v1369_v57 }
0x1051   :  { %v1372_v58 = vpop.xlane.xlu1 %1371 }
0x1052   :  { %v1375_v14 = vadd.f32 1e-06, %v1373_v13  ;;  %v1374_v59 = vmul.f32 0.03125, %v1372_v58 }
0x1054   :  { %1694 = vrsqrt.f32 %v1375_v14  ;;  %v1376_v60 = vadd.f32 1e-06, %v1374_v59 }
0x1056   :  { %1696 = vrsqrt.f32 %v1376_v60 }
0x105e   :  { %v1695_v61 = vpop.eup %1694 }
0x105f   :  { %v1379_v63 = vmul.f32 %v1695_v61, %v1363_v50 }
0x1060   :  { %v1697_v17 = vpop.eup %1696 }
0x1061   :  { %v1380_v1 = vmul.f32 %v1697_v17, %v1364_v52  ;;  %v1387_v2 = vmul.f32 %v1459_v62, %v1379_v63 }
0x1063   :  { %v1388_v3 = vmul.f32 %v1459_v62, %v1380_v1  ;;  %v1395_v4 = vadd.f32 %v1460_v18, %v1387_v2 }
0x1065   :  { %v1396_v5 = vadd.f32 %v1460_v18, %v1388_v3  ;;  %1397 = vst.msk [vmem:[#allocation17] sm:$0xff] %vm217_vm1, %v1395_v4 }
0x1067   :  { %1398 = vst.msk [vmem:[#allocation17 + $0x8] sm:$0xff] %vm217_vm1, %v1396_v5 }
0x1068   :  { %1907 = shalt.err (!%p1904_p6)
}
0x1069   :  { %s2486_s24 = sld [smem:[#allocation30_spill]] }
0x106f   :  { %s1908_s7 = scalar_lea.hbm %s2486_s24, 256 }
0x1070   :  { %p1909_p7 = scmp.ne.s32.totalorder %s2486_s24, %s1908_s7  ;;  %p1912_p8 = scmp.lt.u32.totalorder %s1908_s7, %s2486_s24 }
0x1072   :  { %p1914_p9 = pnand %p1912_p8, %p1909_p7 }
0x1074   :  { %1917 = shalt.err (!%p1914_p9)
}
0x1075   :  { %1410 = dma.vmem_to_hbm [thread:$0]  %s1405_s0, 256, %s2486_s24, [#allocation4], %s2481_s22, %s2481_s22, %s2480_s4  }
0x1076   :  { %1928 = dma.done.wait [#allocation4], 256  }
0x1077   :  { %1929 = vsyncadd [#allocation4], 4294967040 }
0x1078   :  { %1414 = vsyncpa [#allocation3], 1 }
0x1079   :  { %1415 = vsyncpa [#allocation6], 1 }
0x107a   :  { %1416 = vsyncpa [#allocation9], 1 }
0x107b   :  { %1417 = vsyncpa [#allocation12], 1 }
0x107c   :  { %1418 = vsyncpa [#allocation15], 1 }
0x107d   :  { %1419 = vsyncpa [#allocation4], 1 }

</bundles_post_ra>
